<compile_context>
chip_gen: v6e
topology: v6e:2x2x1
jax: 0.10.0
libtpu: 0.0.40
codegen_flags: <defaults>
</compile_context>

<pallas_src>
import numpy as np
import jax
import jax.numpy as jnp
from jax import lax
from jax.experimental import pallas as pl
from jax.experimental.pallas import tpu as pltpu


# ----------------------------------------------------------------------------
# Fused Pallas kernel (all LSTM layers + FC in one call, no grid)
# ----------------------------------------------------------------------------
def make_fused_lstm_kernel(num_layers, seq_len, batch_p, hidden):
    """Positional ref layout:
      x_ref                               (T*Bp, D)       time-major padded input
      wih_l, whh_l, b_l  for each layer   (D_l, 4H), (H, 4H), (1, 4H)
      fcw_ref, fcb_ref                    (H, O), (1, O)
      out_ref                             (T*Bp, O)
      gates_sc (scratch)                  (T*Bp, 4H)      hoisted input projection
      act_sc   (scratch)                  (T*Bp, H)       inter-layer activations
    """

    def kernel(*refs):
        x_ref = refs[0]
        layer_refs = [(refs[1 + 3 * l], refs[2 + 3 * l], refs[3 + 3 * l])
                      for l in range(num_layers)]
        fcw_ref = refs[1 + 3 * num_layers]
        fcb_ref = refs[2 + 3 * num_layers]
        out_ref = refs[3 + 3 * num_layers]
        gates_sc = refs[4 + 3 * num_layers]
        act_sc = refs[5 + 3 * num_layers]

        T, Bp, H = seq_len, batch_p, hidden

        # Lane mask selecting the g (cell candidate) gate columns: hoisted once
        # (broadcast_in_dim is not CSE'd, so never build it per step).
        lane = lax.broadcasted_iota(jnp.int32, (Bp, 4 * H), dimension=1)
        g_mask = (lane >= 2 * H) & (lane < 3 * H)

        for l, (wih_ref, whh_ref, b_ref) in enumerate(layer_refs):
            # 1) Input projection hoisted out of the recurrence: one big MXU
            #    matmul over all timesteps, bias folded in.  (Read the previous
            #    layer's activations BEFORE the time loop overwrites them.)
            x_in = x_ref[...] if l == 0 else act_sc[...]
            gates_sc[...] = (jnp.dot(x_in, wih_ref[...],
                                     preferred_element_type=jnp.float32)
                             + b_ref[...])

            whh = whh_ref[...]                        # hoisted (H, 4H)

            def step(t, carry, whh=whh):
                h, c = carry
                row = pl.multiple_of(t * Bp, Bp)      # aligned sublane window
                g_pre = (gates_sc[pl.ds(row, Bp), :]
                         + jnp.dot(h, whh, preferred_element_type=jnp.float32))
                # Full-vreg nonlinearities + lane select (gate order i,f,g,o).
                act = jnp.where(g_mask, jnp.tanh(g_pre), jax.nn.sigmoid(g_pre))
                i_g = act[:, 0 * H:1 * H]
                f_g = act[:, 1 * H:2 * H]
                g_g = act[:, 2 * H:3 * H]
                o_g = act[:, 3 * H:4 * H]
                c_new = f_g * c + i_g * g_g
                h_new = o_g * jnp.tanh(c_new)
                act_sc[pl.ds(row, Bp), :] = h_new     # stays in VMEM
                return h_new, c_new

            init = (jnp.zeros((Bp, H), jnp.float32),
                    jnp.zeros((Bp, H), jnp.float32))
            lax.fori_loop(0, T, step, init, unroll=min(T, 8))

        # 2) FC epilogue: one matmul + one contiguous slab store to HBM.
        out_ref[...] = (jnp.dot(act_sc[...], fcw_ref[...],
                                preferred_element_type=jnp.float32)
                        + fcb_ref[...]).astype(out_ref.dtype)

    return kernel


# ----------------------------------------------------------------------------
# Wrapper
# ----------------------------------------------------------------------------
def lstm_padding_aware_forward(x, x_lens, params, total_length):
    """x: (B, total_length, input_dim) batch_first; x_lens: python ints (static,
    mirroring the CPU lengths PyTorch requires).  Returns (sum(x_lens), output_dim)
    with the same row order as the PyTorch module."""
    B, T, D = x.shape
    assert T == total_length
    num_layers = len(params["lstm_layers"])
    H = params["lstm_layers"][0][1].shape[1]
    O = params["fc_w"].shape[0]
    Bp = int(np.ceil(B / 8) * 8)                       # pad batch to sublane mult

    # Time-major, batch-padded, flattened to 2-D once on the host side.
    x_p = jnp.pad(x.astype(jnp.float32), ((0, Bp - B), (0, 0), (0, 0)))
    x_tm = jnp.transpose(x_p, (1, 0, 2)).reshape(T * Bp, D)   # (T*Bp, D)

    operands = [x_tm]
    in_specs = [pl.BlockSpec((T * Bp, D), lambda: (0, 0))]
    for l, (w_ih, w_hh, b_ih, b_hh) in enumerate(params["lstm_layers"]):
        d_l = D if l == 0 else H
        operands += [jnp.asarray(w_ih.T, jnp.float32),                 # (d_l, 4H)
                     jnp.asarray(w_hh.T, jnp.float32),                 # (H, 4H)
                     jnp.asarray((b_ih + b_hh)[None, :], jnp.float32)]  # (1, 4H)
        in_specs += [pl.BlockSpec((d_l, 4 * H), lambda: (0, 0)),
                     pl.BlockSpec((H, 4 * H), lambda: (0, 0)),
                     pl.BlockSpec((1, 4 * H), lambda: (0, 0))]
    operands += [jnp.asarray(params["fc_w"].T, jnp.float32),           # (H, O)
                 jnp.asarray(params["fc_b"][None, :], jnp.float32)]    # (1, O)
    in_specs += [pl.BlockSpec((H, O), lambda: (0, 0)),
                 pl.BlockSpec((1, O), lambda: (0, 0))]

    out_flat = pl.pallas_call(
        make_fused_lstm_kernel(num_layers, T, Bp, H),
        out_shape=jax.ShapeDtypeStruct((T * Bp, O), jnp.float32),
        in_specs=in_specs,
        out_specs=pl.BlockSpec((T * Bp, O), lambda: (0, 0)),
        scratch_shapes=[pltpu.VMEM((T * Bp, 4 * H), jnp.float32),
                        pltpu.VMEM((T * Bp, H), jnp.float32)],
        compiler_params=pltpu.CompilerParams(vmem_limit_bytes=32 * 1024 * 1024),
    )(*operands)

    # Gather valid rows in PyTorch order (batch-major, time-ascending).  Row
    # (b, t) lives at flat index t*Bp + b in the time-major output; padded
    # batch rows (b >= B) are never referenced.
    idx = np.concatenate([np.arange(int(x_lens[i])) * Bp + i
                          for i in range(B)]).astype(np.int32)
    return out_flat[jnp.asarray(idx)]


# ----------------------------------------------------------------------------
# Pure-JAX reference (f32 HIGHEST precision, local to these dots only)
# ----------------------------------------------------------------------------
def reference_forward(x, x_lens, params, total_length):
    B, T, _ = x.shape
    hp = jax.lax.Precision.HIGHEST
    out = x.astype(jnp.float32)
    for (w_ih, w_hh, b_ih, b_hh) in params["lstm_layers"]:
        H = w_hh.shape[1]
        h = jnp.zeros((B, H), jnp.float32)
        c = jnp.zeros((B, H), jnp.float32)
        ys = []
        for t in range(T):
            g = (jnp.dot(out[:, t], w_ih.T, precision=hp)
                 + jnp.dot(h, w_hh.T, precision=hp) + b_ih + b_hh)
            i = jax.nn.sigmoid(g[:, 0 * H:1 * H])
            f = jax.nn.sigmoid(g[:, 1 * H:2 * H])
            gg = jnp.tanh(g[:, 2 * H:3 * H])
            o = jax.nn.sigmoid(g[:, 3 * H:4 * H])
            c = f * c + i * gg
            h = o * jnp.tanh(c)
            ys.append(h)
        out = jnp.stack(ys, axis=1)
    out_flat = out.reshape(B * T, -1)
    idx = np.concatenate([np.arange(T * i, T * i + int(x_lens[i]))
                          for i in range(B)]).astype(np.int32)
    out_fc = out_flat[jnp.asarray(idx)]
    return jnp.dot(out_fc, params["fc_w"].T, precision=hp) + params["fc_b"]


# ----------------------------------------------------------------------------
# Deterministic parameter init (PyTorch-style uniform(-1/sqrt(H), 1/sqrt(H)))
# ----------------------------------------------------------------------------
def init_params(key, input_dim, hidden_dim, output_dim, num_layers):
    k = 1.0 / np.sqrt(hidden_dim)
    layers = []
    for layer in range(num_layers):
        d_in = input_dim if layer == 0 else hidden_dim
        key, k1, k2, k3, k4 = jax.random.split(key, 5)
        layers.append((
            jax.random.uniform(k1, (4 * hidden_dim, d_in), jnp.float32, -k, k),
            jax.random.uniform(k2, (4 * hidden_dim, hidden_dim), jnp.float32, -k, k),
            jax.random.uniform(k3, (4 * hidden_dim,), jnp.float32, -k, k),
            jax.random.uniform(k4, (4 * hidden_dim,), jnp.float32, -k, k),
        ))
    key, kw, kb = jax.random.split(key, 3)
    fc_w = jax.random.uniform(kw, (output_dim, hidden_dim), jnp.float32, -k, k)
    fc_b = jax.random.uniform(kb, (output_dim,), jnp.float32, -k, k)
    return {"lstm_layers": layers, "fc_w": fc_w, "fc_b": fc_b}


# ----------------------------------------------------------------------------
# Main
# ----------------------------------------------------------------------------
if __name__ == "__main__":
    # module config: LSTMPaddingAware(input_dim, hidden_dim, output_dim,
    #                                 num_layers, dropout, total_length)
    input_dim, hidden_dim, output_dim = 4, 32, 8
    num_layers, dropout, total_length = 2, 0.0, 8
    batch = 2
    # TODO(synk): inter-layer dropout (PyTorch training mode only) is not modeled.

    key = jax.random.PRNGKey(0)
    key, kx = jax.random.split(key)
    x = jax.random.normal(kx, (batch, total_length, input_dim), jnp.float32)
    x_lens = [8, 5]  # valid lengths (any order, each <= total_length)

    params = init_params(key, input_dim, hidden_dim, output_dim, num_layers)

    out = lstm_padding_aware_forward(x, x_lens, params, total_length)
    out = jax.block_until_ready(out)

    ref = jax.block_until_ready(reference_forward(x, x_lens, params, total_length))
    assert out.shape == (sum(x_lens), output_dim), out.shape
    # Tolerance sized for default (non-'highest') MXU matmul precision in the
    # kernel vs. the f32 HIGHEST-precision reference.
    assert np.allclose(np.asarray(out), np.asarray(ref), rtol=2e-2, atol=2e-2)

    print("KERNEL_OK")
</pallas_src>

<mosaic_0001>
module attributes {stable_mosaic.version = 11 : i64} {
  func.func @kernel(%arg0: memref<64x4xf32, #tpu.memory_space<vmem>>, %arg1: memref<4x128xf32, #tpu.memory_space<vmem>>, %arg2: memref<32x128xf32, #tpu.memory_space<vmem>>, %arg3: memref<1x128xf32, #tpu.memory_space<vmem>>, %arg4: memref<32x128xf32, #tpu.memory_space<vmem>>, %arg5: memref<32x128xf32, #tpu.memory_space<vmem>>, %arg6: memref<1x128xf32, #tpu.memory_space<vmem>>, %arg7: memref<32x8xf32, #tpu.memory_space<vmem>>, %arg8: memref<1x8xf32, #tpu.memory_space<vmem>>, %arg9: memref<64x8xf32, #tpu.memory_space<vmem>>, %arg10: memref<64x128xf32, #tpu.memory_space<vmem>>, %arg11: memref<64x32xf32, #tpu.memory_space<vmem>>) attributes {dimension_semantics = [], scalar_prefetch = 0 : i64, scratch_operands = 2 : i64, tpu.core_type = #tpu.core_type<tc>} {
    %0 = tpu.iota {dimensions = array<i32: 1>} : vector<8x128xi32>
    %c64_i32 = arith.constant 64 : i32
    %1 = vector.broadcast %c64_i32 : i32 to vector<8x128xi32>
    %2 = arith.cmpi sge, %0, %1 : vector<8x128xi32>
    %c96_i32 = arith.constant 96 : i32
    %3 = vector.broadcast %c96_i32 : i32 to vector<8x128xi32>
    %4 = arith.cmpi slt, %0, %3 : vector<8x128xi32>
    %5 = arith.andi %2, %4 : vector<8x128xi1>
    %c0 = arith.constant 0 : index
    %c0_0 = arith.constant 0 : index
    %6 = vector.load %arg0[%c0, %c0_0] : memref<64x4xf32, #tpu.memory_space<vmem>>, vector<64x4xf32>
    %c0_1 = arith.constant 0 : index
    %c0_2 = arith.constant 0 : index
    %7 = vector.load %arg1[%c0_1, %c0_2] : memref<4x128xf32, #tpu.memory_space<vmem>>, vector<4x128xf32>
    %cst = arith.constant dense<0.000000e+00> : vector<64x128xf32>
    %8 = tpu.matmul %6, %7, %cst {dimension_numbers = #tpu.dot_dimension_numbers<[1], [0], [0], [1], [0, 0, 1, 1], [], []>} : vector<64x4xf32>, vector<4x128xf32>, vector<64x128xf32> -> vector<64x128xf32>
    %c0_3 = arith.constant 0 : index
    %c0_4 = arith.constant 0 : index
    %9 = vector.load %arg3[%c0_3, %c0_4] : memref<1x128xf32, #tpu.memory_space<vmem>>, vector<1x128xf32>
    %10 = vector.broadcast %9 : vector<1x128xf32> to vector<64x128xf32>
    %11 = arith.addf %8, %10 : vector<64x128xf32>
    %c0_5 = arith.constant 0 : index
    %c0_6 = arith.constant 0 : index
    %12 = vector.load %arg10[%c0_5, %c0_6] : memref<64x128xf32, #tpu.memory_space<vmem>>, vector<64x128xf32>
    tpu.vector_store %arg10[%c0_5, %c0_6], %11 {strides = array<i32>} : memref<64x128xf32, #tpu.memory_space<vmem>>, vector<64x128xf32>,
    %c0_7 = arith.constant 0 : index
    %c0_8 = arith.constant 0 : index
    %13 = vector.load %arg2[%c0_7, %c0_8] : memref<32x128xf32, #tpu.memory_space<vmem>>, vector<32x128xf32>
    %cst_9 = arith.constant 0.000000e+00 : f32
    %14 = vector.broadcast %cst_9 : f32 to vector<8x32xf32>
    %cst_10 = arith.constant 0.000000e+00 : f32
    %15 = vector.broadcast %cst_10 : f32 to vector<8x32xf32>
    %c0_i32 = arith.constant 0 : i32
    %c8_i32 = arith.constant 8 : i32
    %16 = arith.muli %c0_i32, %c8_i32 : i32
    %17 = tpu.assume_multiple %16, 8 : i32
    %18 = arith.index_cast %17 : i32 to index
    %c0_11 = arith.constant 0 : index
    %19 = vector.load %arg10[%18, %c0_11] : memref<64x128xf32, #tpu.memory_space<vmem>>, vector<8x128xf32>
    %cst_12 = arith.constant dense<0.000000e+00> : vector<8x128xf32>
    %20 = tpu.matmul %14, %13, %cst_12 {dimension_numbers = #tpu.dot_dimension_numbers<[1], [0], [0], [1], [0, 0, 1, 1], [], []>} : vector<8x32xf32>, vector<32x128xf32>, vector<8x128xf32> -> vector<8x128xf32>
    %21 = arith.addf %19, %20 : vector<8x128xf32>
    %22 = math.tanh %21 : vector<8x128xf32>
    %23 = arith.negf %21 : vector<8x128xf32>
    %24 = math.exp %23 : vector<8x128xf32>
    %cst_13 = arith.constant 1.000000e+00 : f32
    %25 = vector.broadcast %cst_13 : f32 to vector<8x128xf32>
    %26 = arith.addf %25, %24 : vector<8x128xf32>
    %27 = arith.divf %25, %26 : vector<8x128xf32>
    %28 = arith.select %5, %22, %27 : vector<8x128xi1>, vector<8x128xf32>
    %29 = vector.extract_strided_slice %28 {offsets = [0, 0], sizes = [8, 32], strides = [1, 1]} : vector<8x128xf32> to vector<8x32xf32>
    %30 = vector.extract_strided_slice %28 {offsets = [0, 32], sizes = [8, 32], strides = [1, 1]} : vector<8x128xf32> to vector<8x32xf32>
    %31 = vector.extract_strided_slice %28 {offsets = [0, 64], sizes = [8, 32], strides = [1, 1]} : vector<8x128xf32> to vector<8x32xf32>
    %32 = vector.extract_strided_slice %28 {offsets = [0, 96], sizes = [8, 32], strides = [1, 1]} : vector<8x128xf32> to vector<8x32xf32>
    %33 = arith.mulf %30, %15 : vector<8x32xf32>
    %34 = arith.mulf %29, %31 : vector<8x32xf32>
    %35 = arith.addf %33, %34 : vector<8x32xf32>
    %36 = math.tanh %35 : vector<8x32xf32>
    %37 = arith.mulf %32, %36 : vector<8x32xf32>
    %38 = arith.index_cast %17 : i32 to index
    %c0_14 = arith.constant 0 : index
    %39 = vector.load %arg11[%38, %c0_14] : memref<64x32xf32, #tpu.memory_space<vmem>>, vector<8x32xf32>
    tpu.vector_store %arg11[%38, %c0_14], %37 {strides = array<i32>} : memref<64x32xf32, #tpu.memory_space<vmem>>, vector<8x32xf32>,
    %c1_i32 = arith.constant 1 : i32
    %c8_i32_15 = arith.constant 8 : i32
    %40 = arith.muli %c1_i32, %c8_i32_15 : i32
    %41 = tpu.assume_multiple %40, 8 : i32
    %42 = arith.index_cast %41 : i32 to index
    %c0_16 = arith.constant 0 : index
    %43 = vector.load %arg10[%42, %c0_16] : memref<64x128xf32, #tpu.memory_space<vmem>>, vector<8x128xf32>
    %cst_17 = arith.constant dense<0.000000e+00> : vector<8x128xf32>
    %44 = tpu.matmul %37, %13, %cst_17 {dimension_numbers = #tpu.dot_dimension_numbers<[1], [0], [0], [1], [0, 0, 1, 1], [], []>} : vector<8x32xf32>, vector<32x128xf32>, vector<8x128xf32> -> vector<8x128xf32>
    %45 = arith.addf %43, %44 : vector<8x128xf32>
    %46 = math.tanh %45 : vector<8x128xf32>
    %47 = arith.negf %45 : vector<8x128xf32>
    %48 = math.exp %47 : vector<8x128xf32>
    %cst_18 = arith.constant 1.000000e+00 : f32
    %49 = vector.broadcast %cst_18 : f32 to vector<8x128xf32>
    %50 = arith.addf %49, %48 : vector<8x128xf32>
    %51 = arith.divf %49, %50 : vector<8x128xf32>
    %52 = arith.select %5, %46, %51 : vector<8x128xi1>, vector<8x128xf32>
    %53 = vector.extract_strided_slice %52 {offsets = [0, 0], sizes = [8, 32], strides = [1, 1]} : vector<8x128xf32> to vector<8x32xf32>
    %54 = vector.extract_strided_slice %52 {offsets = [0, 32], sizes = [8, 32], strides = [1, 1]} : vector<8x128xf32> to vector<8x32xf32>
    %55 = vector.extract_strided_slice %52 {offsets = [0, 64], sizes = [8, 32], strides = [1, 1]} : vector<8x128xf32> to vector<8x32xf32>
    %56 = vector.extract_strided_slice %52 {offsets = [0, 96], sizes = [8, 32], strides = [1, 1]} : vector<8x128xf32> to vector<8x32xf32>
    %57 = arith.mulf %54, %35 : vector<8x32xf32>
    %58 = arith.mulf %53, %55 : vector<8x32xf32>
    %59 = arith.addf %57, %58 : vector<8x32xf32>
    %60 = math.tanh %59 : vector<8x32xf32>
    %61 = arith.mulf %56, %60 : vector<8x32xf32>
    %62 = arith.index_cast %41 : i32 to index
    %c0_19 = arith.constant 0 : index
    %63 = vector.load %arg11[%62, %c0_19] : memref<64x32xf32, #tpu.memory_space<vmem>>, vector<8x32xf32>
    tpu.vector_store %arg11[%62, %c0_19], %61 {strides = array<i32>} : memref<64x32xf32, #tpu.memory_space<vmem>>, vector<8x32xf32>,
    %c2_i32 = arith.constant 2 : i32
    %c8_i32_20 = arith.constant 8 : i32
    %64 = arith.muli %c2_i32, %c8_i32_20 : i32
    %65 = tpu.assume_multiple %64, 8 : i32
    %66 = arith.index_cast %65 : i32 to index
    %c0_21 = arith.constant 0 : index
    %67 = vector.load %arg10[%66, %c0_21] : memref<64x128xf32, #tpu.memory_space<vmem>>, vector<8x128xf32>
    %cst_22 = arith.constant dense<0.000000e+00> : vector<8x128xf32>
    %68 = tpu.matmul %61, %13, %cst_22 {dimension_numbers = #tpu.dot_dimension_numbers<[1], [0], [0], [1], [0, 0, 1, 1], [], []>} : vector<8x32xf32>, vector<32x128xf32>, vector<8x128xf32> -> vector<8x128xf32>
    %69 = arith.addf %67, %68 : vector<8x128xf32>
    %70 = math.tanh %69 : vector<8x128xf32>
    %71 = arith.negf %69 : vector<8x128xf32>
    %72 = math.exp %71 : vector<8x128xf32>
    %cst_23 = arith.constant 1.000000e+00 : f32
    %73 = vector.broadcast %cst_23 : f32 to vector<8x128xf32>
    %74 = arith.addf %73, %72 : vector<8x128xf32>
    %75 = arith.divf %73, %74 : vector<8x128xf32>
    %76 = arith.select %5, %70, %75 : vector<8x128xi1>, vector<8x128xf32>
    %77 = vector.extract_strided_slice %76 {offsets = [0, 0], sizes = [8, 32], strides = [1, 1]} : vector<8x128xf32> to vector<8x32xf32>
    %78 = vector.extract_strided_slice %76 {offsets = [0, 32], sizes = [8, 32], strides = [1, 1]} : vector<8x128xf32> to vector<8x32xf32>
    %79 = vector.extract_strided_slice %76 {offsets = [0, 64], sizes = [8, 32], strides = [1, 1]} : vector<8x128xf32> to vector<8x32xf32>
    %80 = vector.extract_strided_slice %76 {offsets = [0, 96], sizes = [8, 32], strides = [1, 1]} : vector<8x128xf32> to vector<8x32xf32>
    %81 = arith.mulf %78, %59 : vector<8x32xf32>
    %82 = arith.mulf %77, %79 : vector<8x32xf32>
    %83 = arith.addf %81, %82 : vector<8x32xf32>
    %84 = math.tanh %83 : vector<8x32xf32>
    %85 = arith.mulf %80, %84 : vector<8x32xf32>
    %86 = arith.index_cast %65 : i32 to index
    %c0_24 = arith.constant 0 : index
    %87 = vector.load %arg11[%86, %c0_24] : memref<64x32xf32, #tpu.memory_space<vmem>>, vector<8x32xf32>
    tpu.vector_store %arg11[%86, %c0_24], %85 {strides = array<i32>} : memref<64x32xf32, #tpu.memory_space<vmem>>, vector<8x32xf32>,
    %c3_i32 = arith.constant 3 : i32
    %c8_i32_25 = arith.constant 8 : i32
    %88 = arith.muli %c3_i32, %c8_i32_25 : i32
    %89 = tpu.assume_multiple %88, 8 : i32
    %90 = arith.index_cast %89 : i32 to index
    %c0_26 = arith.constant 0 : index
    %91 = vector.load %arg10[%90, %c0_26] : memref<64x128xf32, #tpu.memory_space<vmem>>, vector<8x128xf32>
    %cst_27 = arith.constant dense<0.000000e+00> : vector<8x128xf32>
    %92 = tpu.matmul %85, %13, %cst_27 {dimension_numbers = #tpu.dot_dimension_numbers<[1], [0], [0], [1], [0, 0, 1, 1], [], []>} : vector<8x32xf32>, vector<32x128xf32>, vector<8x128xf32> -> vector<8x128xf32>
    %93 = arith.addf %91, %92 : vector<8x128xf32>
    %94 = math.tanh %93 : vector<8x128xf32>
    %95 = arith.negf %93 : vector<8x128xf32>
    %96 = math.exp %95 : vector<8x128xf32>
    %cst_28 = arith.constant 1.000000e+00 : f32
    %97 = vector.broadcast %cst_28 : f32 to vector<8x128xf32>
    %98 = arith.addf %97, %96 : vector<8x128xf32>
    %99 = arith.divf %97, %98 : vector<8x128xf32>
    %100 = arith.select %5, %94, %99 : vector<8x128xi1>, vector<8x128xf32>
    %101 = vector.extract_strided_slice %100 {offsets = [0, 0], sizes = [8, 32], strides = [1, 1]} : vector<8x128xf32> to vector<8x32xf32>
    %102 = vector.extract_strided_slice %100 {offsets = [0, 32], sizes = [8, 32], strides = [1, 1]} : vector<8x128xf32> to vector<8x32xf32>
    %103 = vector.extract_strided_slice %100 {offsets = [0, 64], sizes = [8, 32], strides = [1, 1]} : vector<8x128xf32> to vector<8x32xf32>
    %104 = vector.extract_strided_slice %100 {offsets = [0, 96], sizes = [8, 32], strides = [1, 1]} : vector<8x128xf32> to vector<8x32xf32>
    %105 = arith.mulf %102, %83 : vector<8x32xf32>
    %106 = arith.mulf %101, %103 : vector<8x32xf32>
    %107 = arith.addf %105, %106 : vector<8x32xf32>
    %108 = math.tanh %107 : vector<8x32xf32>
    %109 = arith.mulf %104, %108 : vector<8x32xf32>
    %110 = arith.index_cast %89 : i32 to index
    %c0_29 = arith.constant 0 : index
    %111 = vector.load %arg11[%110, %c0_29] : memref<64x32xf32, #tpu.memory_space<vmem>>, vector<8x32xf32>
    tpu.vector_store %arg11[%110, %c0_29], %109 {strides = array<i32>} : memref<64x32xf32, #tpu.memory_space<vmem>>, vector<8x32xf32>,
    %c4_i32 = arith.constant 4 : i32
    %c8_i32_30 = arith.constant 8 : i32
    %112 = arith.muli %c4_i32, %c8_i32_30 : i32
    %113 = tpu.assume_multiple %112, 8 : i32
    %114 = arith.index_cast %113 : i32 to index
    %c0_31 = arith.constant 0 : index
    %115 = vector.load %arg10[%114, %c0_31] : memref<64x128xf32, #tpu.memory_space<vmem>>, vector<8x128xf32>
    %cst_32 = arith.constant dense<0.000000e+00> : vector<8x128xf32>
    %116 = tpu.matmul %109, %13, %cst_32 {dimension_numbers = #tpu.dot_dimension_numbers<[1], [0], [0], [1], [0, 0, 1, 1], [], []>} : vector<8x32xf32>, vector<32x128xf32>, vector<8x128xf32> -> vector<8x128xf32>
    %117 = arith.addf %115, %116 : vector<8x128xf32>
    %118 = math.tanh %117 : vector<8x128xf32>
    %119 = arith.negf %117 : vector<8x128xf32>
    %120 = math.exp %119 : vector<8x128xf32>
    %cst_33 = arith.constant 1.000000e+00 : f32
    %121 = vector.broadcast %cst_33 : f32 to vector<8x128xf32>
    %122 = arith.addf %121, %120 : vector<8x128xf32>
    %123 = arith.divf %121, %122 : vector<8x128xf32>
    %124 = arith.select %5, %118, %123 : vector<8x128xi1>, vector<8x128xf32>
    %125 = vector.extract_strided_slice %124 {offsets = [0, 0], sizes = [8, 32], strides = [1, 1]} : vector<8x128xf32> to vector<8x32xf32>
    %126 = vector.extract_strided_slice %124 {offsets = [0, 32], sizes = [8, 32], strides = [1, 1]} : vector<8x128xf32> to vector<8x32xf32>
    %127 = vector.extract_strided_slice %124 {offsets = [0, 64], sizes = [8, 32], strides = [1, 1]} : vector<8x128xf32> to vector<8x32xf32>
    %128 = vector.extract_strided_slice %124 {offsets = [0, 96], sizes = [8, 32], strides = [1, 1]} : vector<8x128xf32> to vector<8x32xf32>
    %129 = arith.mulf %126, %107 : vector<8x32xf32>
    %130 = arith.mulf %125, %127 : vector<8x32xf32>
    %131 = arith.addf %129, %130 : vector<8x32xf32>
    %132 = math.tanh %131 : vector<8x32xf32>
    %133 = arith.mulf %128, %132 : vector<8x32xf32>
    %134 = arith.index_cast %113 : i32 to index
    %c0_34 = arith.constant 0 : index
    %135 = vector.load %arg11[%134, %c0_34] : memref<64x32xf32, #tpu.memory_space<vmem>>, vector<8x32xf32>
    tpu.vector_store %arg11[%134, %c0_34], %133 {strides = array<i32>} : memref<64x32xf32, #tpu.memory_space<vmem>>, vector<8x32xf32>,
    %c5_i32 = arith.constant 5 : i32
    %c8_i32_35 = arith.constant 8 : i32
    %136 = arith.muli %c5_i32, %c8_i32_35 : i32
    %137 = tpu.assume_multiple %136, 8 : i32
    %138 = arith.index_cast %137 : i32 to index
    %c0_36 = arith.constant 0 : index
    %139 = vector.load %arg10[%138, %c0_36] : memref<64x128xf32, #tpu.memory_space<vmem>>, vector<8x128xf32>
    %cst_37 = arith.constant dense<0.000000e+00> : vector<8x128xf32>
    %140 = tpu.matmul %133, %13, %cst_37 {dimension_numbers = #tpu.dot_dimension_numbers<[1], [0], [0], [1], [0, 0, 1, 1], [], []>} : vector<8x32xf32>, vector<32x128xf32>, vector<8x128xf32> -> vector<8x128xf32>
    %141 = arith.addf %139, %140 : vector<8x128xf32>
    %142 = math.tanh %141 : vector<8x128xf32>
    %143 = arith.negf %141 : vector<8x128xf32>
    %144 = math.exp %143 : vector<8x128xf32>
    %cst_38 = arith.constant 1.000000e+00 : f32
    %145 = vector.broadcast %cst_38 : f32 to vector<8x128xf32>
    %146 = arith.addf %145, %144 : vector<8x128xf32>
    %147 = arith.divf %145, %146 : vector<8x128xf32>
    %148 = arith.select %5, %142, %147 : vector<8x128xi1>, vector<8x128xf32>
    %149 = vector.extract_strided_slice %148 {offsets = [0, 0], sizes = [8, 32], strides = [1, 1]} : vector<8x128xf32> to vector<8x32xf32>
    %150 = vector.extract_strided_slice %148 {offsets = [0, 32], sizes = [8, 32], strides = [1, 1]} : vector<8x128xf32> to vector<8x32xf32>
    %151 = vector.extract_strided_slice %148 {offsets = [0, 64], sizes = [8, 32], strides = [1, 1]} : vector<8x128xf32> to vector<8x32xf32>
    %152 = vector.extract_strided_slice %148 {offsets = [0, 96], sizes = [8, 32], strides = [1, 1]} : vector<8x128xf32> to vector<8x32xf32>
    %153 = arith.mulf %150, %131 : vector<8x32xf32>
    %154 = arith.mulf %149, %151 : vector<8x32xf32>
    %155 = arith.addf %153, %154 : vector<8x32xf32>
    %156 = math.tanh %155 : vector<8x32xf32>
    %157 = arith.mulf %152, %156 : vector<8x32xf32>
    %158 = arith.index_cast %137 : i32 to index
    %c0_39 = arith.constant 0 : index
    %159 = vector.load %arg11[%158, %c0_39] : memref<64x32xf32, #tpu.memory_space<vmem>>, vector<8x32xf32>
    tpu.vector_store %arg11[%158, %c0_39], %157 {strides = array<i32>} : memref<64x32xf32, #tpu.memory_space<vmem>>, vector<8x32xf32>,
    %c6_i32 = arith.constant 6 : i32
    %c8_i32_40 = arith.constant 8 : i32
    %160 = arith.muli %c6_i32, %c8_i32_40 : i32
    %161 = tpu.assume_multiple %160, 8 : i32
    %162 = arith.index_cast %161 : i32 to index
    %c0_41 = arith.constant 0 : index
    %163 = vector.load %arg10[%162, %c0_41] : memref<64x128xf32, #tpu.memory_space<vmem>>, vector<8x128xf32>
    %cst_42 = arith.constant dense<0.000000e+00> : vector<8x128xf32>
    %164 = tpu.matmul %157, %13, %cst_42 {dimension_numbers = #tpu.dot_dimension_numbers<[1], [0], [0], [1], [0, 0, 1, 1], [], []>} : vector<8x32xf32>, vector<32x128xf32>, vector<8x128xf32> -> vector<8x128xf32>
    %165 = arith.addf %163, %164 : vector<8x128xf32>
    %166 = math.tanh %165 : vector<8x128xf32>
    %167 = arith.negf %165 : vector<8x128xf32>
    %168 = math.exp %167 : vector<8x128xf32>
    %cst_43 = arith.constant 1.000000e+00 : f32
    %169 = vector.broadcast %cst_43 : f32 to vector<8x128xf32>
    %170 = arith.addf %169, %168 : vector<8x128xf32>
    %171 = arith.divf %169, %170 : vector<8x128xf32>
    %172 = arith.select %5, %166, %171 : vector<8x128xi1>, vector<8x128xf32>
    %173 = vector.extract_strided_slice %172 {offsets = [0, 0], sizes = [8, 32], strides = [1, 1]} : vector<8x128xf32> to vector<8x32xf32>
    %174 = vector.extract_strided_slice %172 {offsets = [0, 32], sizes = [8, 32], strides = [1, 1]} : vector<8x128xf32> to vector<8x32xf32>
    %175 = vector.extract_strided_slice %172 {offsets = [0, 64], sizes = [8, 32], strides = [1, 1]} : vector<8x128xf32> to vector<8x32xf32>
    %176 = vector.extract_strided_slice %172 {offsets = [0, 96], sizes = [8, 32], strides = [1, 1]} : vector<8x128xf32> to vector<8x32xf32>
    %177 = arith.mulf %174, %155 : vector<8x32xf32>
    %178 = arith.mulf %173, %175 : vector<8x32xf32>
    %179 = arith.addf %177, %178 : vector<8x32xf32>
    %180 = math.tanh %179 : vector<8x32xf32>
    %181 = arith.mulf %176, %180 : vector<8x32xf32>
    %182 = arith.index_cast %161 : i32 to index
    %c0_44 = arith.constant 0 : index
    %183 = vector.load %arg11[%182, %c0_44] : memref<64x32xf32, #tpu.memory_space<vmem>>, vector<8x32xf32>
    tpu.vector_store %arg11[%182, %c0_44], %181 {strides = array<i32>} : memref<64x32xf32, #tpu.memory_space<vmem>>, vector<8x32xf32>,
    %c7_i32 = arith.constant 7 : i32
    %c8_i32_45 = arith.constant 8 : i32
    %184 = arith.muli %c7_i32, %c8_i32_45 : i32
    %185 = tpu.assume_multiple %184, 8 : i32
    %186 = arith.index_cast %185 : i32 to index
    %c0_46 = arith.constant 0 : index
    %187 = vector.load %arg10[%186, %c0_46] : memref<64x128xf32, #tpu.memory_space<vmem>>, vector<8x128xf32>
    %cst_47 = arith.constant dense<0.000000e+00> : vector<8x128xf32>
    %188 = tpu.matmul %181, %13, %cst_47 {dimension_numbers = #tpu.dot_dimension_numbers<[1], [0], [0], [1], [0, 0, 1, 1], [], []>} : vector<8x32xf32>, vector<32x128xf32>, vector<8x128xf32> -> vector<8x128xf32>
    %189 = arith.addf %187, %188 : vector<8x128xf32>
    %190 = math.tanh %189 : vector<8x128xf32>
    %191 = arith.negf %189 : vector<8x128xf32>
    %192 = math.exp %191 : vector<8x128xf32>
    %cst_48 = arith.constant 1.000000e+00 : f32
    %193 = vector.broadcast %cst_48 : f32 to vector<8x128xf32>
    %194 = arith.addf %193, %192 : vector<8x128xf32>
    %195 = arith.divf %193, %194 : vector<8x128xf32>
    %196 = arith.select %5, %190, %195 : vector<8x128xi1>, vector<8x128xf32>
    %197 = vector.extract_strided_slice %196 {offsets = [0, 0], sizes = [8, 32], strides = [1, 1]} : vector<8x128xf32> to vector<8x32xf32>
    %198 = vector.extract_strided_slice %196 {offsets = [0, 32], sizes = [8, 32], strides = [1, 1]} : vector<8x128xf32> to vector<8x32xf32>
    %199 = vector.extract_strided_slice %196 {offsets = [0, 64], sizes = [8, 32], strides = [1, 1]} : vector<8x128xf32> to vector<8x32xf32>
    %200 = vector.extract_strided_slice %196 {offsets = [0, 96], sizes = [8, 32], strides = [1, 1]} : vector<8x128xf32> to vector<8x32xf32>
    %201 = arith.mulf %198, %179 : vector<8x32xf32>
    %202 = arith.mulf %197, %199 : vector<8x32xf32>
    %203 = arith.addf %201, %202 : vector<8x32xf32>
    %204 = math.tanh %203 : vector<8x32xf32>
    %205 = arith.mulf %200, %204 : vector<8x32xf32>
    %206 = arith.index_cast %185 : i32 to index
    %c0_49 = arith.constant 0 : index
    %207 = vector.load %arg11[%206, %c0_49] : memref<64x32xf32, #tpu.memory_space<vmem>>, vector<8x32xf32>
    tpu.vector_store %arg11[%206, %c0_49], %205 {strides = array<i32>} : memref<64x32xf32, #tpu.memory_space<vmem>>, vector<8x32xf32>,
    %c8_i32_50 = arith.constant 8 : i32
    %c0_51 = arith.constant 0 : index
    %c0_52 = arith.constant 0 : index
    %208 = vector.load %arg11[%c0_51, %c0_52] : memref<64x32xf32, #tpu.memory_space<vmem>>, vector<64x32xf32>
    %c0_53 = arith.constant 0 : index
    %c0_54 = arith.constant 0 : index
    %209 = vector.load %arg4[%c0_53, %c0_54] : memref<32x128xf32, #tpu.memory_space<vmem>>, vector<32x128xf32>
    %cst_55 = arith.constant dense<0.000000e+00> : vector<64x128xf32>
    %210 = tpu.matmul %208, %209, %cst_55 {dimension_numbers = #tpu.dot_dimension_numbers<[1], [0], [0], [1], [0, 0, 1, 1], [], []>} : vector<64x32xf32>, vector<32x128xf32>, vector<64x128xf32> -> vector<64x128xf32>
    %c0_56 = arith.constant 0 : index
    %c0_57 = arith.constant 0 : index
    %211 = vector.load %arg6[%c0_56, %c0_57] : memref<1x128xf32, #tpu.memory_space<vmem>>, vector<1x128xf32>
    %212 = vector.broadcast %211 : vector<1x128xf32> to vector<64x128xf32>
    %213 = arith.addf %210, %212 : vector<64x128xf32>
    %c0_58 = arith.constant 0 : index
    %c0_59 = arith.constant 0 : index
    %214 = vector.load %arg10[%c0_58, %c0_59] : memref<64x128xf32, #tpu.memory_space<vmem>>, vector<64x128xf32>
    tpu.vector_store %arg10[%c0_58, %c0_59], %213 {strides = array<i32>} : memref<64x128xf32, #tpu.memory_space<vmem>>, vector<64x128xf32>,
    %c0_60 = arith.constant 0 : index
    %c0_61 = arith.constant 0 : index
    %215 = vector.load %arg5[%c0_60, %c0_61] : memref<32x128xf32, #tpu.memory_space<vmem>>, vector<32x128xf32>
    %cst_62 = arith.constant 0.000000e+00 : f32
    %216 = vector.broadcast %cst_62 : f32 to vector<8x32xf32>
    %cst_63 = arith.constant 0.000000e+00 : f32
    %217 = vector.broadcast %cst_63 : f32 to vector<8x32xf32>
    %c0_i32_64 = arith.constant 0 : i32
    %c8_i32_65 = arith.constant 8 : i32
    %218 = arith.muli %c0_i32_64, %c8_i32_65 : i32
    %219 = tpu.assume_multiple %218, 8 : i32
    %220 = arith.index_cast %219 : i32 to index
    %c0_66 = arith.constant 0 : index
    %221 = vector.load %arg10[%220, %c0_66] : memref<64x128xf32, #tpu.memory_space<vmem>>, vector<8x128xf32>
    %cst_67 = arith.constant dense<0.000000e+00> : vector<8x128xf32>
    %222 = tpu.matmul %216, %215, %cst_67 {dimension_numbers = #tpu.dot_dimension_numbers<[1], [0], [0], [1], [0, 0, 1, 1], [], []>} : vector<8x32xf32>, vector<32x128xf32>, vector<8x128xf32> -> vector<8x128xf32>
    %223 = arith.addf %221, %222 : vector<8x128xf32>
    %224 = math.tanh %223 : vector<8x128xf32>
    %225 = arith.negf %223 : vector<8x128xf32>
    %226 = math.exp %225 : vector<8x128xf32>
    %cst_68 = arith.constant 1.000000e+00 : f32
    %227 = vector.broadcast %cst_68 : f32 to vector<8x128xf32>
    %228 = arith.addf %227, %226 : vector<8x128xf32>
    %229 = arith.divf %227, %228 : vector<8x128xf32>
    %230 = arith.select %5, %224, %229 : vector<8x128xi1>, vector<8x128xf32>
    %231 = vector.extract_strided_slice %230 {offsets = [0, 0], sizes = [8, 32], strides = [1, 1]} : vector<8x128xf32> to vector<8x32xf32>
    %232 = vector.extract_strided_slice %230 {offsets = [0, 32], sizes = [8, 32], strides = [1, 1]} : vector<8x128xf32> to vector<8x32xf32>
    %233 = vector.extract_strided_slice %230 {offsets = [0, 64], sizes = [8, 32], strides = [1, 1]} : vector<8x128xf32> to vector<8x32xf32>
    %234 = vector.extract_strided_slice %230 {offsets = [0, 96], sizes = [8, 32], strides = [1, 1]} : vector<8x128xf32> to vector<8x32xf32>
    %235 = arith.mulf %232, %217 : vector<8x32xf32>
    %236 = arith.mulf %231, %233 : vector<8x32xf32>
    %237 = arith.addf %235, %236 : vector<8x32xf32>
    %238 = math.tanh %237 : vector<8x32xf32>
    %239 = arith.mulf %234, %238 : vector<8x32xf32>
    %240 = arith.index_cast %219 : i32 to index
    %c0_69 = arith.constant 0 : index
    %241 = vector.load %arg11[%240, %c0_69] : memref<64x32xf32, #tpu.memory_space<vmem>>, vector<8x32xf32>
    tpu.vector_store %arg11[%240, %c0_69], %239 {strides = array<i32>} : memref<64x32xf32, #tpu.memory_space<vmem>>, vector<8x32xf32>,
    %c1_i32_70 = arith.constant 1 : i32
    %c8_i32_71 = arith.constant 8 : i32
    %242 = arith.muli %c1_i32_70, %c8_i32_71 : i32
    %243 = tpu.assume_multiple %242, 8 : i32
    %244 = arith.index_cast %243 : i32 to index
    %c0_72 = arith.constant 0 : index
    %245 = vector.load %arg10[%244, %c0_72] : memref<64x128xf32, #tpu.memory_space<vmem>>, vector<8x128xf32>
    %cst_73 = arith.constant dense<0.000000e+00> : vector<8x128xf32>
    %246 = tpu.matmul %239, %215, %cst_73 {dimension_numbers = #tpu.dot_dimension_numbers<[1], [0], [0], [1], [0, 0, 1, 1], [], []>} : vector<8x32xf32>, vector<32x128xf32>, vector<8x128xf32> -> vector<8x128xf32>
    %247 = arith.addf %245, %246 : vector<8x128xf32>
    %248 = math.tanh %247 : vector<8x128xf32>
    %249 = arith.negf %247 : vector<8x128xf32>
    %250 = math.exp %249 : vector<8x128xf32>
    %cst_74 = arith.constant 1.000000e+00 : f32
    %251 = vector.broadcast %cst_74 : f32 to vector<8x128xf32>
    %252 = arith.addf %251, %250 : vector<8x128xf32>
    %253 = arith.divf %251, %252 : vector<8x128xf32>
    %254 = arith.select %5, %248, %253 : vector<8x128xi1>, vector<8x128xf32>
    %255 = vector.extract_strided_slice %254 {offsets = [0, 0], sizes = [8, 32], strides = [1, 1]} : vector<8x128xf32> to vector<8x32xf32>
    %256 = vector.extract_strided_slice %254 {offsets = [0, 32], sizes = [8, 32], strides = [1, 1]} : vector<8x128xf32> to vector<8x32xf32>
    %257 = vector.extract_strided_slice %254 {offsets = [0, 64], sizes = [8, 32], strides = [1, 1]} : vector<8x128xf32> to vector<8x32xf32>
    %258 = vector.extract_strided_slice %254 {offsets = [0, 96], sizes = [8, 32], strides = [1, 1]} : vector<8x128xf32> to vector<8x32xf32>
    %259 = arith.mulf %256, %237 : vector<8x32xf32>
    %260 = arith.mulf %255, %257 : vector<8x32xf32>
    %261 = arith.addf %259, %260 : vector<8x32xf32>
    %262 = math.tanh %261 : vector<8x32xf32>
    %263 = arith.mulf %258, %262 : vector<8x32xf32>
    %264 = arith.index_cast %243 : i32 to index
    %c0_75 = arith.constant 0 : index
    %265 = vector.load %arg11[%264, %c0_75] : memref<64x32xf32, #tpu.memory_space<vmem>>, vector<8x32xf32>
    tpu.vector_store %arg11[%264, %c0_75], %263 {strides = array<i32>} : memref<64x32xf32, #tpu.memory_space<vmem>>, vector<8x32xf32>,
    %c2_i32_76 = arith.constant 2 : i32
    %c8_i32_77 = arith.constant 8 : i32
    %266 = arith.muli %c2_i32_76, %c8_i32_77 : i32
    %267 = tpu.assume_multiple %266, 8 : i32
    %268 = arith.index_cast %267 : i32 to index
    %c0_78 = arith.constant 0 : index
    %269 = vector.load %arg10[%268, %c0_78] : memref<64x128xf32, #tpu.memory_space<vmem>>, vector<8x128xf32>
    %cst_79 = arith.constant dense<0.000000e+00> : vector<8x128xf32>
    %270 = tpu.matmul %263, %215, %cst_79 {dimension_numbers = #tpu.dot_dimension_numbers<[1], [0], [0], [1], [0, 0, 1, 1], [], []>} : vector<8x32xf32>, vector<32x128xf32>, vector<8x128xf32> -> vector<8x128xf32>
    %271 = arith.addf %269, %270 : vector<8x128xf32>
    %272 = math.tanh %271 : vector<8x128xf32>
    %273 = arith.negf %271 : vector<8x128xf32>
    %274 = math.exp %273 : vector<8x128xf32>
    %cst_80 = arith.constant 1.000000e+00 : f32
    %275 = vector.broadcast %cst_80 : f32 to vector<8x128xf32>
    %276 = arith.addf %275, %274 : vector<8x128xf32>
    %277 = arith.divf %275, %276 : vector<8x128xf32>
    %278 = arith.select %5, %272, %277 : vector<8x128xi1>, vector<8x128xf32>
    %279 = vector.extract_strided_slice %278 {offsets = [0, 0], sizes = [8, 32], strides = [1, 1]} : vector<8x128xf32> to vector<8x32xf32>
    %280 = vector.extract_strided_slice %278 {offsets = [0, 32], sizes = [8, 32], strides = [1, 1]} : vector<8x128xf32> to vector<8x32xf32>
    %281 = vector.extract_strided_slice %278 {offsets = [0, 64], sizes = [8, 32], strides = [1, 1]} : vector<8x128xf32> to vector<8x32xf32>
    %282 = vector.extract_strided_slice %278 {offsets = [0, 96], sizes = [8, 32], strides = [1, 1]} : vector<8x128xf32> to vector<8x32xf32>
    %283 = arith.mulf %280, %261 : vector<8x32xf32>
    %284 = arith.mulf %279, %281 : vector<8x32xf32>
    %285 = arith.addf %283, %284 : vector<8x32xf32>
    %286 = math.tanh %285 : vector<8x32xf32>
    %287 = arith.mulf %282, %286 : vector<8x32xf32>
    %288 = arith.index_cast %267 : i32 to index
    %c0_81 = arith.constant 0 : index
    %289 = vector.load %arg11[%288, %c0_81] : memref<64x32xf32, #tpu.memory_space<vmem>>, vector<8x32xf32>
    tpu.vector_store %arg11[%288, %c0_81], %287 {strides = array<i32>} : memref<64x32xf32, #tpu.memory_space<vmem>>, vector<8x32xf32>,
    %c3_i32_82 = arith.constant 3 : i32
    %c8_i32_83 = arith.constant 8 : i32
    %290 = arith.muli %c3_i32_82, %c8_i32_83 : i32
    %291 = tpu.assume_multiple %290, 8 : i32
    %292 = arith.index_cast %291 : i32 to index
    %c0_84 = arith.constant 0 : index
    %293 = vector.load %arg10[%292, %c0_84] : memref<64x128xf32, #tpu.memory_space<vmem>>, vector<8x128xf32>
    %cst_85 = arith.constant dense<0.000000e+00> : vector<8x128xf32>
    %294 = tpu.matmul %287, %215, %cst_85 {dimension_numbers = #tpu.dot_dimension_numbers<[1], [0], [0], [1], [0, 0, 1, 1], [], []>} : vector<8x32xf32>, vector<32x128xf32>, vector<8x128xf32> -> vector<8x128xf32>
    %295 = arith.addf %293, %294 : vector<8x128xf32>
    %296 = math.tanh %295 : vector<8x128xf32>
    %297 = arith.negf %295 : vector<8x128xf32>
    %298 = math.exp %297 : vector<8x128xf32>
    %cst_86 = arith.constant 1.000000e+00 : f32
    %299 = vector.broadcast %cst_86 : f32 to vector<8x128xf32>
    %300 = arith.addf %299, %298 : vector<8x128xf32>
    %301 = arith.divf %299, %300 : vector<8x128xf32>
    %302 = arith.select %5, %296, %301 : vector<8x128xi1>, vector<8x128xf32>
    %303 = vector.extract_strided_slice %302 {offsets = [0, 0], sizes = [8, 32], strides = [1, 1]} : vector<8x128xf32> to vector<8x32xf32>
    %304 = vector.extract_strided_slice %302 {offsets = [0, 32], sizes = [8, 32], strides = [1, 1]} : vector<8x128xf32> to vector<8x32xf32>
    %305 = vector.extract_strided_slice %302 {offsets = [0, 64], sizes = [8, 32], strides = [1, 1]} : vector<8x128xf32> to vector<8x32xf32>
    %306 = vector.extract_strided_slice %302 {offsets = [0, 96], sizes = [8, 32], strides = [1, 1]} : vector<8x128xf32> to vector<8x32xf32>
    %307 = arith.mulf %304, %285 : vector<8x32xf32>
    %308 = arith.mulf %303, %305 : vector<8x32xf32>
    %309 = arith.addf %307, %308 : vector<8x32xf32>
    %310 = math.tanh %309 : vector<8x32xf32>
    %311 = arith.mulf %306, %310 : vector<8x32xf32>
    %312 = arith.index_cast %291 : i32 to index
    %c0_87 = arith.constant 0 : index
    %313 = vector.load %arg11[%312, %c0_87] : memref<64x32xf32, #tpu.memory_space<vmem>>, vector<8x32xf32>
    tpu.vector_store %arg11[%312, %c0_87], %311 {strides = array<i32>} : memref<64x32xf32, #tpu.memory_space<vmem>>, vector<8x32xf32>,
    %c4_i32_88 = arith.constant 4 : i32
    %c8_i32_89 = arith.constant 8 : i32
    %314 = arith.muli %c4_i32_88, %c8_i32_89 : i32
    %315 = tpu.assume_multiple %314, 8 : i32
    %316 = arith.index_cast %315 : i32 to index
    %c0_90 = arith.constant 0 : index
    %317 = vector.load %arg10[%316, %c0_90] : memref<64x128xf32, #tpu.memory_space<vmem>>, vector<8x128xf32>
    %cst_91 = arith.constant dense<0.000000e+00> : vector<8x128xf32>
    %318 = tpu.matmul %311, %215, %cst_91 {dimension_numbers = #tpu.dot_dimension_numbers<[1], [0], [0], [1], [0, 0, 1, 1], [], []>} : vector<8x32xf32>, vector<32x128xf32>, vector<8x128xf32> -> vector<8x128xf32>
    %319 = arith.addf %317, %318 : vector<8x128xf32>
    %320 = math.tanh %319 : vector<8x128xf32>
    %321 = arith.negf %319 : vector<8x128xf32>
    %322 = math.exp %321 : vector<8x128xf32>
    %cst_92 = arith.constant 1.000000e+00 : f32
    %323 = vector.broadcast %cst_92 : f32 to vector<8x128xf32>
    %324 = arith.addf %323, %322 : vector<8x128xf32>
    %325 = arith.divf %323, %324 : vector<8x128xf32>
    %326 = arith.select %5, %320, %325 : vector<8x128xi1>, vector<8x128xf32>
    %327 = vector.extract_strided_slice %326 {offsets = [0, 0], sizes = [8, 32], strides = [1, 1]} : vector<8x128xf32> to vector<8x32xf32>
    %328 = vector.extract_strided_slice %326 {offsets = [0, 32], sizes = [8, 32], strides = [1, 1]} : vector<8x128xf32> to vector<8x32xf32>
    %329 = vector.extract_strided_slice %326 {offsets = [0, 64], sizes = [8, 32], strides = [1, 1]} : vector<8x128xf32> to vector<8x32xf32>
    %330 = vector.extract_strided_slice %326 {offsets = [0, 96], sizes = [8, 32], strides = [1, 1]} : vector<8x128xf32> to vector<8x32xf32>
    %331 = arith.mulf %328, %309 : vector<8x32xf32>
    %332 = arith.mulf %327, %329 : vector<8x32xf32>
    %333 = arith.addf %331, %332 : vector<8x32xf32>
    %334 = math.tanh %333 : vector<8x32xf32>
    %335 = arith.mulf %330, %334 : vector<8x32xf32>
    %336 = arith.index_cast %315 : i32 to index
    %c0_93 = arith.constant 0 : index
    %337 = vector.load %arg11[%336, %c0_93] : memref<64x32xf32, #tpu.memory_space<vmem>>, vector<8x32xf32>
    tpu.vector_store %arg11[%336, %c0_93], %335 {strides = array<i32>} : memref<64x32xf32, #tpu.memory_space<vmem>>, vector<8x32xf32>,
    %c5_i32_94 = arith.constant 5 : i32
    %c8_i32_95 = arith.constant 8 : i32
    %338 = arith.muli %c5_i32_94, %c8_i32_95 : i32
    %339 = tpu.assume_multiple %338, 8 : i32
    %340 = arith.index_cast %339 : i32 to index
    %c0_96 = arith.constant 0 : index
    %341 = vector.load %arg10[%340, %c0_96] : memref<64x128xf32, #tpu.memory_space<vmem>>, vector<8x128xf32>
    %cst_97 = arith.constant dense<0.000000e+00> : vector<8x128xf32>
    %342 = tpu.matmul %335, %215, %cst_97 {dimension_numbers = #tpu.dot_dimension_numbers<[1], [0], [0], [1], [0, 0, 1, 1], [], []>} : vector<8x32xf32>, vector<32x128xf32>, vector<8x128xf32> -> vector<8x128xf32>
    %343 = arith.addf %341, %342 : vector<8x128xf32>
    %344 = math.tanh %343 : vector<8x128xf32>
    %345 = arith.negf %343 : vector<8x128xf32>
    %346 = math.exp %345 : vector<8x128xf32>
    %cst_98 = arith.constant 1.000000e+00 : f32
    %347 = vector.broadcast %cst_98 : f32 to vector<8x128xf32>
    %348 = arith.addf %347, %346 : vector<8x128xf32>
    %349 = arith.divf %347, %348 : vector<8x128xf32>
    %350 = arith.select %5, %344, %349 : vector<8x128xi1>, vector<8x128xf32>
    %351 = vector.extract_strided_slice %350 {offsets = [0, 0], sizes = [8, 32], strides = [1, 1]} : vector<8x128xf32> to vector<8x32xf32>
    %352 = vector.extract_strided_slice %350 {offsets = [0, 32], sizes = [8, 32], strides = [1, 1]} : vector<8x128xf32> to vector<8x32xf32>
    %353 = vector.extract_strided_slice %350 {offsets = [0, 64], sizes = [8, 32], strides = [1, 1]} : vector<8x128xf32> to vector<8x32xf32>
    %354 = vector.extract_strided_slice %350 {offsets = [0, 96], sizes = [8, 32], strides = [1, 1]} : vector<8x128xf32> to vector<8x32xf32>
    %355 = arith.mulf %352, %333 : vector<8x32xf32>
    %356 = arith.mulf %351, %353 : vector<8x32xf32>
    %357 = arith.addf %355, %356 : vector<8x32xf32>
    %358 = math.tanh %357 : vector<8x32xf32>
    %359 = arith.mulf %354, %358 : vector<8x32xf32>
    %360 = arith.index_cast %339 : i32 to index
    %c0_99 = arith.constant 0 : index
    %361 = vector.load %arg11[%360, %c0_99] : memref<64x32xf32, #tpu.memory_space<vmem>>, vector<8x32xf32>
    tpu.vector_store %arg11[%360, %c0_99], %359 {strides = array<i32>} : memref<64x32xf32, #tpu.memory_space<vmem>>, vector<8x32xf32>,
    %c6_i32_100 = arith.constant 6 : i32
    %c8_i32_101 = arith.constant 8 : i32
    %362 = arith.muli %c6_i32_100, %c8_i32_101 : i32
    %363 = tpu.assume_multiple %362, 8 : i32
    %364 = arith.index_cast %363 : i32 to index
    %c0_102 = arith.constant 0 : index
    %365 = vector.load %arg10[%364, %c0_102] : memref<64x128xf32, #tpu.memory_space<vmem>>, vector<8x128xf32>
    %cst_103 = arith.constant dense<0.000000e+00> : vector<8x128xf32>
    %366 = tpu.matmul %359, %215, %cst_103 {dimension_numbers = #tpu.dot_dimension_numbers<[1], [0], [0], [1], [0, 0, 1, 1], [], []>} : vector<8x32xf32>, vector<32x128xf32>, vector<8x128xf32> -> vector<8x128xf32>
    %367 = arith.addf %365, %366 : vector<8x128xf32>
    %368 = math.tanh %367 : vector<8x128xf32>
    %369 = arith.negf %367 : vector<8x128xf32>
    %370 = math.exp %369 : vector<8x128xf32>
    %cst_104 = arith.constant 1.000000e+00 : f32
    %371 = vector.broadcast %cst_104 : f32 to vector<8x128xf32>
    %372 = arith.addf %371, %370 : vector<8x128xf32>
    %373 = arith.divf %371, %372 : vector<8x128xf32>
    %374 = arith.select %5, %368, %373 : vector<8x128xi1>, vector<8x128xf32>
    %375 = vector.extract_strided_slice %374 {offsets = [0, 0], sizes = [8, 32], strides = [1, 1]} : vector<8x128xf32> to vector<8x32xf32>
    %376 = vector.extract_strided_slice %374 {offsets = [0, 32], sizes = [8, 32], strides = [1, 1]} : vector<8x128xf32> to vector<8x32xf32>
    %377 = vector.extract_strided_slice %374 {offsets = [0, 64], sizes = [8, 32], strides = [1, 1]} : vector<8x128xf32> to vector<8x32xf32>
    %378 = vector.extract_strided_slice %374 {offsets = [0, 96], sizes = [8, 32], strides = [1, 1]} : vector<8x128xf32> to vector<8x32xf32>
    %379 = arith.mulf %376, %357 : vector<8x32xf32>
    %380 = arith.mulf %375, %377 : vector<8x32xf32>
    %381 = arith.addf %379, %380 : vector<8x32xf32>
    %382 = math.tanh %381 : vector<8x32xf32>
    %383 = arith.mulf %378, %382 : vector<8x32xf32>
    %384 = arith.index_cast %363 : i32 to index
    %c0_105 = arith.constant 0 : index
    %385 = vector.load %arg11[%384, %c0_105] : memref<64x32xf32, #tpu.memory_space<vmem>>, vector<8x32xf32>
    tpu.vector_store %arg11[%384, %c0_105], %383 {strides = array<i32>} : memref<64x32xf32, #tpu.memory_space<vmem>>, vector<8x32xf32>,
    %c7_i32_106 = arith.constant 7 : i32
    %c8_i32_107 = arith.constant 8 : i32
    %386 = arith.muli %c7_i32_106, %c8_i32_107 : i32
    %387 = tpu.assume_multiple %386, 8 : i32
    %388 = arith.index_cast %387 : i32 to index
    %c0_108 = arith.constant 0 : index
    %389 = vector.load %arg10[%388, %c0_108] : memref<64x128xf32, #tpu.memory_space<vmem>>, vector<8x128xf32>
    %cst_109 = arith.constant dense<0.000000e+00> : vector<8x128xf32>
    %390 = tpu.matmul %383, %215, %cst_109 {dimension_numbers = #tpu.dot_dimension_numbers<[1], [0], [0], [1], [0, 0, 1, 1], [], []>} : vector<8x32xf32>, vector<32x128xf32>, vector<8x128xf32> -> vector<8x128xf32>
    %391 = arith.addf %389, %390 : vector<8x128xf32>
    %392 = math.tanh %391 : vector<8x128xf32>
    %393 = arith.negf %391 : vector<8x128xf32>
    %394 = math.exp %393 : vector<8x128xf32>
    %cst_110 = arith.constant 1.000000e+00 : f32
    %395 = vector.broadcast %cst_110 : f32 to vector<8x128xf32>
    %396 = arith.addf %395, %394 : vector<8x128xf32>
    %397 = arith.divf %395, %396 : vector<8x128xf32>
    %398 = arith.select %5, %392, %397 : vector<8x128xi1>, vector<8x128xf32>
    %399 = vector.extract_strided_slice %398 {offsets = [0, 0], sizes = [8, 32], strides = [1, 1]} : vector<8x128xf32> to vector<8x32xf32>
    %400 = vector.extract_strided_slice %398 {offsets = [0, 32], sizes = [8, 32], strides = [1, 1]} : vector<8x128xf32> to vector<8x32xf32>
    %401 = vector.extract_strided_slice %398 {offsets = [0, 64], sizes = [8, 32], strides = [1, 1]} : vector<8x128xf32> to vector<8x32xf32>
    %402 = vector.extract_strided_slice %398 {offsets = [0, 96], sizes = [8, 32], strides = [1, 1]} : vector<8x128xf32> to vector<8x32xf32>
    %403 = arith.mulf %400, %381 : vector<8x32xf32>
    %404 = arith.mulf %399, %401 : vector<8x32xf32>
    %405 = arith.addf %403, %404 : vector<8x32xf32>
    %406 = math.tanh %405 : vector<8x32xf32>
    %407 = arith.mulf %402, %406 : vector<8x32xf32>
    %408 = arith.index_cast %387 : i32 to index
    %c0_111 = arith.constant 0 : index
    %409 = vector.load %arg11[%408, %c0_111] : memref<64x32xf32, #tpu.memory_space<vmem>>, vector<8x32xf32>
    tpu.vector_store %arg11[%408, %c0_111], %407 {strides = array<i32>} : memref<64x32xf32, #tpu.memory_space<vmem>>, vector<8x32xf32>,
    %c8_i32_112 = arith.constant 8 : i32
    %c0_113 = arith.constant 0 : index
    %c0_114 = arith.constant 0 : index
    %410 = vector.load %arg11[%c0_113, %c0_114] : memref<64x32xf32, #tpu.memory_space<vmem>>, vector<64x32xf32>
    %c0_115 = arith.constant 0 : index
    %c0_116 = arith.constant 0 : index
    %411 = vector.load %arg7[%c0_115, %c0_116] : memref<32x8xf32, #tpu.memory_space<vmem>>, vector<32x8xf32>
    %cst_117 = arith.constant dense<0.000000e+00> : vector<64x8xf32>
    %412 = tpu.matmul %410, %411, %cst_117 {dimension_numbers = #tpu.dot_dimension_numbers<[1], [0], [0], [1], [0, 0, 1, 1], [], []>} : vector<64x32xf32>, vector<32x8xf32>, vector<64x8xf32> -> vector<64x8xf32>
    %c0_118 = arith.constant 0 : index
    %c0_119 = arith.constant 0 : index
    %413 = vector.load %arg8[%c0_118, %c0_119] : memref<1x8xf32, #tpu.memory_space<vmem>>, vector<1x8xf32>
    %414 = vector.broadcast %413 : vector<1x8xf32> to vector<64x8xf32>
    %415 = arith.addf %412, %414 : vector<64x8xf32>
    %c0_120 = arith.constant 0 : index
    %c0_121 = arith.constant 0 : index
    %416 = vector.load %arg9[%c0_120, %c0_121] : memref<64x8xf32, #tpu.memory_space<vmem>>, vector<64x8xf32>
    tpu.vector_store %arg9[%c0_120, %c0_121], %415 {strides = array<i32>} : memref<64x8xf32, #tpu.memory_space<vmem>>, vector<64x8xf32>,
    return
  }
}

</mosaic_0001>

<bundles_post_ra>
// kernel: tpu_custom_call.1
= control target key start
LH: loop header
LB: loop body
LE: loop exit
PB: predicated region body
PF: predicated region fallthrough
CT: control target
= control target key end

     0   :  { %vm78_vm0 = vcmask 1043456   ;;  %vm53_vm1 = vcmask 31744   ;;  %v2733_v5 = vmov 0.0   ;;  %vm2734_vm2 = vmmov 0   ;;  %s2736_s10 = smov 32   ;;  %s3304_s1 = inlined_call_operand.vmem [shape: f32[4,128], index: 1, kind: input, shape index: {}]   ;;  %s3305_s0 = inlined_call_operand.vmem [shape: f32[64,4], index: 0, kind: input, shape index: {}]   ;;  %s3306_s2 = inlined_call_operand.vmem [shape: f32[32,128], index: 2, kind: input, shape index: {}]   ;;  %s3307_s3 = inlined_call_operand.vmem [shape: f32[1,128], index: 3, kind: input, shape index: {}]   ;;  %s3308_s4 = inlined_call_operand.vmem [shape: f32[32,128], index: 4, kind: input, shape index: {}]   ;;  %s3309_s5 = inlined_call_operand.vmem [shape: f32[32,128], index: 5, kind: input, shape index: {}]   ;;  %s3310_s6 = inlined_call_operand.vmem [shape: f32[1,128], index: 6, kind: input, shape index: {}]   ;;  %s3311_s7 = inlined_call_operand.vmem [shape: f32[32,8], index: 7, kind: input, shape index: {}]   ;;  %s3312_s8 = inlined_call_operand.vmem [shape: f32[1,8], index: 8, kind: input, shape index: {}]   ;;  %s3313_s9 = inlined_call_operand.vmem [shape: f32[64,8], index: 9, kind: output, shape index: {}]  }
   0x1   :  { %v45_v0 = vld [vmem:[%s3304_s1] sm:$0xf]  ;;  %v42_v2 = vld [vmem:[%s3305_s0 + $0x28] sm:$0xff]  ;;  %v2801_v3 = vld [vmem:[%s3306_s2 + $0x18] sm:$0xff]  ;;  %v32_v26 = vlaneseq  ;;  %vm200_vm6 = vcmask 261120   ;;  %vm2185_vm7 = vcmask 64512  }
   0x2   :  { %v41_v1 = vld [vmem:[%s3305_s0 + $0x20] sm:$0xff]  ;;  %2599 = vmatprep.subr.msk.mxu1 %vm78_vm0, %v45_v0  ;;  %2369 = vmatprep.subr.msk.mxu0 %vm78_vm0, %v45_v0  ;;  %v38_v6 = vld [vmem:[%s3305_s0 + $0x8] sm:$0xff]  ;;  %v43_v7 = vld [vmem:[%s3305_s0 + $0x30] sm:$0xff] }
   0x3   :  { %2377 = vmatprep.mubr.msk.f32.mxu1 %vm53_vm1, %v41_v1  ;;  %2600 = vmatpush3.msk.msra.mxu1 %vm78_vm0, %v45_v0  ;;  %v37_v4 = vld [vmem:[%s3305_s0] sm:$0xff]  ;;  %v2821_v8 = vld [vmem:[%s3306_s2 + $0x10] sm:$0xff]  ;;  %v44_v9 = vld [vmem:[%s3305_s0 + $0x38] sm:$0xff]  ;;  %v33_v27 = vand.u32 127, %v32_v26 }
   0x4   :  { %2378 = vmatmul.mubr.msk.f32.vlgmr.msra.gmra.mxu1 %vm53_vm1, %v42_v2  ;;  %2383 = vmatprep.subr.mxu1 %v2733_v5  ;;  %v2833_v10 = vld [vmem:[%s3306_s2 + $0x8] sm:$0xff]  ;;  %v2842_v11 = vld [vmem:[%s3306_s2] sm:$0xff]  ;;  %v39_v56 = vld [vmem:[%s3305_s0 + $0x10] sm:$0xff] }
   0x5   :  { %2384 = vmatpush3.msra.mxu1 %v2801_v3  ;;  %2370 = vmatpush3.msk.msra.mxu0 %vm78_vm0, %v45_v0  ;;  %v2878_v17 = vld [vmem:[%s3307_s3] ss:$0 sm:$0xff]  ;;  %vm34_vm3 = vcmp.ge.s32.totalorder %v33_v27, 64  ;;  %vm35_vm4 = vcmp.lt.s32.totalorder %v33_v27, 96  ;;  %s2735_s3 = smov 64   ;;  %v40_v57 = vld [vmem:[%s3305_s0 + $0x18] sm:$0xff] }
   0x6   :  { %2371 = vmatprep.mubr.msk.f32.mxu0 %vm53_vm1, %v37_v4  ;;  %2385 = vmatprep.subr.mxu1 %v2733_v5  ;;  %vm2883_vm5 = vmand %vm34_vm3, %vm35_vm4 }
   0x7   :  { %2372 = vmatmul.mubr.msk.f32.vlgmr.msra.gmra.mxu0 %vm53_vm1, %v38_v6  ;;  %2380 = vmatprep.mubr.msk.f32.mxu1 %vm53_vm1, %v43_v7 }
   0x8   :  { %2386 = vmatpush3.msra.mxu1 %v2821_v8  ;;  %2405 = vmatprep.subr.mxu0 %v2733_v5 }
   0x9   :  { %2381 = vmatmul.mubr.msk.f32.gmra.mxu1 %vm53_vm1, %v44_v9  ;;  %2387 = vmatprep.subr.mxu1 %v2733_v5 }
   0xa   :  { %2388 = vmatpush3.msra.mxu1 %v2833_v10  ;;  %2391 = vmatprep.mubr.msk.f32.mxu1 %vm2734_vm2, %v2733_v5 }
   0xb   :  { %2389 = vmatprep.subr.mxu1 %v2733_v5  ;;  %2406 = vmatpush3.msra.mxu0 %v2801_v3 }
   0xc   :  { %2390 = vmatpush3.msra.mxu1 %v2842_v11  ;;  %2407 = vmatprep.subr.mxu0 %v2733_v5 }
   0xd   :  { %2392 = vmatmul.mubr.f32.vlgmr.msra.gmra.mxu1 %v2733_v5  ;;  %2394 = vmatprep.subr.mxu1 %v2733_v5 }
   0xe   :  { %2395 = vmatpush3.msra.mxu1 %v2801_v3  ;;  %2402 = vmatprep.mubr.msk.f32.mxu1 %vm2734_vm2, %v2733_v5 }
   0xf   :  { %2396 = vmatprep.subr.mxu1 %v2733_v5  ;;  %2408 = vmatpush3.msra.mxu0 %v2821_v8 }
  0x10   :  { %2397 = vmatpush3.msra.mxu1 %v2821_v8  ;;  %2409 = vmatprep.subr.mxu0 %v2733_v5 }
  0x11   :  { %2398 = vmatprep.subr.mxu1 %v2733_v5  ;;  %2410 = vmatpush3.msra.mxu0 %v2833_v10 }
  0x12   :  { %2399 = vmatpush3.msra.mxu1 %v2833_v10  ;;  %2411 = vmatprep.subr.mxu0 %v2733_v5 }
  0x13   :  { %2400 = vmatprep.subr.mxu1 %v2733_v5  ;;  %2412 = vmatpush3.msra.mxu0 %v2842_v11 }
  0x14   :  { %2401 = vmatpush3.msra.mxu1 %v2842_v11  ;;  %2427 = vmatprep.subr.mxu0 %v2733_v5 }
  0x15   :  { %2416 = vmatprep.subr.mxu1 %v2733_v5  ;;  %2374 = vmatprep.mubr.msk.f32.mxu0 %vm53_vm1, %v39_v56 }
  0x16   :  { %2375 = vmatmul.mubr.msk.f32.gmra.mxu0 %vm53_vm1, %v40_v57 }
  0x17   :  { %2413 = vmatprep.mubr.msk.f32.mxu0 %vm2734_vm2, %v2733_v5 }
  0xc4   :  { %v2869_v12 = vpop.f32.mrf.mxu1 }
  0xc6   :  { %v2871_v13 = vpop.f32.mrf.mxu1 }
  0xc7   :  { %v2373_v14 = vpop.f32.mrf.mxu0 }
  0xc8   :  { %v154_v41 = vadd.f32 %v2373_v14, %v2878_v17 }
  0xc9   :  { %v2873_v15 = vpop.f32.mrf.mxu1  ;;  %v148_v16 = vpop.f32.mrf.mxu0 }
  0xca   :  { %v149_v19 = vadd.f32 %v2878_v17, %v148_v16 }
  0xcb   :  { %v2880_v18 = vpop.f32.mrf.mxu1 }
  0xcd   :  { %v270_v20 = vpop.f32.mrf.mxu1 }
  0xce   :  { %v274_v21 = vadd.f32 %v270_v20, %v149_v19 }
  0xcf   :  { %v2393_v22 = vpop.f32.mrf.mxu1 }
  0xd0   :  { %v2208_v23 = vmul.f32 -1.442695, %v274_v21 }
  0xd2   :  { %2605 = vpow2.f32 %v2208_v23 }
  0xd3   :  { %2607 = vtanh.f32 %v274_v21 }
  0xd6   :  { %v2376_v62 = vpop.f32.mrf.mxu0 }
  0xd8   :  { %v158_v63 = vpop.f32.mrf.mxu0 }
  0xd9   :  { %v159_v0 = vadd.f32 %v2878_v17, %v158_v63 }
  0xdf   :  { %v2606_v24 = vpop.eup %2605 }
  0xe0   :  { %v279_v25 = vadd.f32 1.0, %v2606_v24  ;;  %v2608_v29 = vpop.eup %2607 }
  0xe2   :  { %2609 = vrcp.f32 %v279_v25 }
  0xef   :  { %v2610_v30 = vpop.eup %2609 }
  0xf0   :  { %v282_v31 = vsel %vm2883_vm5, %v2608_v29, %v2610_v30  ;;  %v164_v30 = vadd.f32 %v2376_v62, %v2878_v17 }
  0xf1   :  { %285 = vrot.lane.b32.xlu0 %v282_v31, %s2735_s3  ;;  %v283_v34 = vmul.f32 0.0, %v282_v31 }
 0x163   :  { %v286_v32 = vpop.permute.xlu0 %285 }
 0x164   :  { %v288_v33 = vmul.f32 %v286_v32, %v282_v31 }
 0x166   :  { %290 = vrot.lane.b32.xlu0 %v288_v33, %s2736_s10 }
 0x1d8   :  { %v291_v35 = vpop.permute.xlu0 %290 }
 0x1d9   :  { %v293_v36 = vadd.f32 %v291_v35, %v283_v34 }
 0x1db   :  { %2611 = vtanh.f32 %v293_v36 }
 0x1e8   :  { %v2612_v37 = vpop.eup %2611 }
 0x1e9   :  { %296 = vrot.lane.b32.xlu1 %v2612_v37, %s2735_s3 }
 0x25b   :  { %v297_v38 = vpop.permute.xlu1 %296 }
 0x25c   :  { %v299_v39 = vmul.f32 %v297_v38, %v282_v31 }
 0x25e   :  { %301 = vrot.lane.b32.xlu1 %v299_v39, %s2736_s10 }
 0x2d0   :  { %v302_v40 = vpop.permute.xlu1 %301 }
 0x2d1   :  { %304 = vst.msk [vmem:[#allocation3] sm:$0xff] %vm200_vm6, %v302_v40  ;;  %2403 = vmatmul.mubr.msk.f32.vlgmr.msra.gmra.mxu1 %vm200_vm6, %v302_v40 }
 0x2d2   :  { %2417 = vmatpush3.msra.mxu1 %v2801_v3  ;;  %2424 = vmatprep.mubr.msk.f32.mxu1 %vm2734_vm2, %v2733_v5 }
 0x2d3   :  { %2418 = vmatprep.subr.mxu1 %v2733_v5 }
 0x2d4   :  { %2419 = vmatpush3.msra.mxu1 %v2821_v8 }
 0x2d5   :  { %2420 = vmatprep.subr.mxu1 %v2733_v5 }
 0x2d6   :  { %2421 = vmatpush3.msra.mxu1 %v2833_v10 }
 0x2d7   :  { %2422 = vmatprep.subr.mxu1 %v2733_v5 }
 0x2d8   :  { %2423 = vmatpush3.msra.mxu1 %v2842_v11 }
 0x2d9   :  { %2438 = vmatprep.subr.mxu1 %v2733_v5 }
 0x391   :  { %v375_v42 = vpop.f32.mrf.mxu1 }
 0x392   :  { %v379_v43 = vadd.f32 %v375_v42, %v154_v41 }
 0x393   :  { %v2404_v44 = vpop.f32.mrf.mxu1 }
 0x394   :  { %v2210_v45 = vmul.f32 -1.442695, %v379_v43 }
 0x396   :  { %2613 = vpow2.f32 %v2210_v45 }
 0x397   :  { %2615 = vtanh.f32 %v379_v43 }
 0x3a3   :  { %v2614_v46 = vpop.eup %2613 }
 0x3a4   :  { %v384_v47 = vadd.f32 1.0, %v2614_v46  ;;  %v2616_v48 = vpop.eup %2615 }
 0x3a6   :  { %2617 = vrcp.f32 %v384_v47 }
 0x3b3   :  { %v2618_v49 = vpop.eup %2617 }
 0x3b4   :  { %v387_v50 = vsel %vm2883_vm5, %v2616_v48, %v2618_v49  ;;  %v169_v49 = vadd.f32 %v2878_v17, %v2871_v13 }
 0x3b5   :  { %390 = vrot.lane.b32.xlu0 %v387_v50, %s2735_s3  ;;  %v388_v53 = vmul.f32 %v387_v50, %v293_v36 }
 0x427   :  { %v391_v51 = vpop.permute.xlu0 %390 }
 0x428   :  { %v393_v52 = vmul.f32 %v391_v51, %v387_v50 }
 0x42a   :  { %395 = vrot.lane.b32.xlu1 %v393_v52, %s2736_s10 }
 0x49c   :  { %v396_v54 = vpop.permute.xlu1 %395 }
 0x49d   :  { %v398_v55 = vadd.f32 %v396_v54, %v388_v53 }
 0x49f   :  { %2619 = vtanh.f32 %v398_v55 }
 0x4ac   :  { %v2620_v58 = vpop.eup %2619 }
 0x4ad   :  { %401 = vrot.lane.b32.xlu0 %v2620_v58, %s2735_s3 }
 0x51f   :  { %v402_v59 = vpop.permute.xlu0 %401 }
 0x520   :  { %v404_v60 = vmul.f32 %v402_v59, %v387_v50 }
 0x522   :  { %406 = vrot.lane.b32.xlu1 %v404_v60, %s2736_s10 }
 0x594   :  { %v407_v61 = vpop.permute.xlu1 %406 }
 0x595   :  { %410 = vst.msk [vmem:[#allocation3 + $0x8] sm:$0xff] %vm200_vm6, %v407_v61  ;;  %2414 = vmatmul.mubr.msk.f32.vlgmr.msra.gmra.mxu0 %vm200_vm6, %v407_v61 }
 0x596   :  { %2428 = vmatpush3.msra.mxu0 %v2801_v3  ;;  %2435 = vmatprep.mubr.msk.f32.mxu0 %vm2734_vm2, %v2733_v5 }
 0x597   :  { %2429 = vmatprep.subr.mxu0 %v2733_v5 }
 0x598   :  { %2430 = vmatpush3.msra.mxu0 %v2821_v8 }
 0x599   :  { %2431 = vmatprep.subr.mxu0 %v2733_v5 }
 0x59a   :  { %2432 = vmatpush3.msra.mxu0 %v2833_v10 }
 0x59b   :  { %2433 = vmatprep.subr.mxu0 %v2733_v5 }
 0x59c   :  { %2434 = vmatpush3.msra.mxu0 %v2842_v11 }
 0x59d   :  { %2449 = vmatprep.subr.mxu0 %v2733_v5 }
 0x655   :  { %v481_v1 = vpop.f32.mrf.mxu0 }
 0x656   :  { %v485_v2 = vadd.f32 %v481_v1, %v159_v0 }
 0x657   :  { %v2415_v4 = vpop.f32.mrf.mxu0 }
 0x658   :  { %v2212_v6 = vmul.f32 -1.442695, %v485_v2 }
 0x65a   :  { %2621 = vpow2.f32 %v2212_v6 }
 0x65b   :  { %2623 = vtanh.f32 %v485_v2 }
 0x667   :  { %v2622_v7 = vpop.eup %2621 }
 0x668   :  { %v490_v9 = vadd.f32 1.0, %v2622_v7  ;;  %v2624_v14 = vpop.eup %2623 }
 0x66a   :  { %2625 = vrcp.f32 %v490_v9 }
 0x677   :  { %v2626_v16 = vpop.eup %2625 }
 0x678   :  { %v493_v19 = vsel %vm2883_vm5, %v2624_v14, %v2626_v16 }
 0x679   :  { %496 = vrot.lane.b32.xlu0 %v493_v19, %s2735_s3  ;;  %v494_v22 = vmul.f32 %v493_v19, %v398_v55 }
 0x6eb   :  { %v497_v20 = vpop.permute.xlu0 %496 }
 0x6ec   :  { %v499_v21 = vmul.f32 %v497_v20, %v493_v19 }
 0x6ee   :  { %501 = vrot.lane.b32.xlu1 %v499_v21, %s2736_s10 }
 0x760   :  { %v502_v23 = vpop.permute.xlu1 %501 }
 0x761   :  { %v504_v24 = vadd.f32 %v502_v23, %v494_v22  ;;  %v1058_v23 = vld [vmem:[%s3308_s4 + $0x18] sm:$0xff] }
 0x763   :  { %2627 = vtanh.f32 %v504_v24 }
 0x770   :  { %v2628_v25 = vpop.eup %2627 }
 0x771   :  { %507 = vrot.lane.b32.xlu0 %v2628_v25, %s2735_s3 }
 0x7e3   :  { %v508_v26 = vpop.permute.xlu0 %507 }
 0x7e4   :  { %v510_v27 = vmul.f32 %v508_v26, %v493_v19 }
 0x7e6   :  { %512 = vrot.lane.b32.xlu1 %v510_v27, %s2736_s10 }
 0x858   :  { %v513_v29 = vpop.permute.xlu1 %512 }
 0x859   :  { %516 = vst.msk [vmem:[#allocation3 + $0x10] sm:$0xff] %vm200_vm6, %v513_v29  ;;  %2425 = vmatmul.mubr.msk.f32.vlgmr.msra.gmra.mxu1 %vm200_vm6, %v513_v29  ;;  %v1057_v29 = vld [vmem:[%s3308_s4 + $0x10] sm:$0xff] }
 0x85a   :  { %2439 = vmatpush3.msra.mxu1 %v2801_v3  ;;  %2446 = vmatprep.mubr.msk.f32.mxu1 %vm2734_vm2, %v2733_v5 }
 0x85b   :  { %2440 = vmatprep.subr.mxu1 %v2733_v5 }
 0x85c   :  { %2441 = vmatpush3.msra.mxu1 %v2821_v8 }
 0x85d   :  { %2442 = vmatprep.subr.mxu1 %v2733_v5 }
 0x85e   :  { %2443 = vmatpush3.msra.mxu1 %v2833_v10 }
 0x85f   :  { %2444 = vmatprep.subr.mxu1 %v2733_v5 }
 0x860   :  { %2445 = vmatpush3.msra.mxu1 %v2842_v11 }
 0x861   :  { %2460 = vmatprep.subr.mxu1 %v2733_v5 }
 0x919   :  { %v587_v31 = vpop.f32.mrf.mxu1 }
 0x91a   :  { %v591_v32 = vadd.f32 %v587_v31, %v164_v30  ;;  %v1047_v30 = vld [vmem:[#allocation3] sm:$0xff]  ;;  %v1056_v31 = vld [vmem:[%s3308_s4 + $0x8] sm:$0xff] }
 0x91b   :  { %v2426_v33 = vpop.f32.mrf.mxu1 }
 0x91c   :  { %v2214_v34 = vmul.f32 -1.442695, %v591_v32  ;;  %v1048_v33 = vld [vmem:[#allocation3 + $0x8] sm:$0xff] }
 0x91e   :  { %2629 = vpow2.f32 %v2214_v34  ;;  %v1049_v34 = vld [vmem:[#allocation3 + $0x10] sm:$0xff] }
 0x91f   :  { %2631 = vtanh.f32 %v591_v32  ;;  %v1055_v32 = vld [vmem:[%s3308_s4] sm:$0xff] }
 0x92b   :  { %v2630_v35 = vpop.eup %2629 }
 0x92c   :  { %v596_v36 = vadd.f32 1.0, %v2630_v35  ;;  %v2632_v37 = vpop.eup %2631 }
 0x92e   :  { %2633 = vrcp.f32 %v596_v36 }
 0x93b   :  { %v2634_v38 = vpop.eup %2633 }
 0x93c   :  { %v599_v39 = vsel %vm2883_vm5, %v2632_v37, %v2634_v38  ;;  %v179_v38 = vadd.f32 %v2878_v17, %v2880_v18 }
 0x93d   :  { %602 = vrot.lane.b32.xlu0 %v599_v39, %s2735_s3  ;;  %v600_v42 = vmul.f32 %v599_v39, %v504_v24 }
 0x9af   :  { %v603_v40 = vpop.permute.xlu0 %602 }
 0x9b0   :  { %v605_v41 = vmul.f32 %v603_v40, %v599_v39 }
 0x9b2   :  { %607 = vrot.lane.b32.xlu1 %v605_v41, %s2736_s10 }
 0xa24   :  { %v608_v43 = vpop.permute.xlu1 %607 }
 0xa25   :  { %v610_v44 = vadd.f32 %v608_v43, %v600_v42 }
 0xa27   :  { %2635 = vtanh.f32 %v610_v44 }
 0xa34   :  { %v2636_v45 = vpop.eup %2635 }
 0xa35   :  { %613 = vrot.lane.b32.xlu0 %v2636_v45, %s2735_s3 }
 0xaa7   :  { %v614_v46 = vpop.permute.xlu0 %613 }
 0xaa8   :  { %v616_v47 = vmul.f32 %v614_v46, %v599_v39 }
 0xaaa   :  { %618 = vrot.lane.b32.xlu1 %v616_v47, %s2736_s10 }
 0xb1c   :  { %v619_v48 = vpop.permute.xlu1 %618 }
 0xb1d   :  { %622 = vst.msk [vmem:[#allocation3 + $0x18] sm:$0xff] %vm200_vm6, %v619_v48  ;;  %2436 = vmatmul.mubr.msk.f32.vlgmr.msra.gmra.mxu0 %vm200_vm6, %v619_v48 }
 0xb1e   :  { %2450 = vmatpush3.msra.mxu0 %v2801_v3  ;;  %2457 = vmatprep.mubr.msk.f32.mxu0 %vm2734_vm2, %v2733_v5 }
 0xb1f   :  { %2451 = vmatprep.subr.mxu0 %v2733_v5 }
 0xb20   :  { %2452 = vmatpush3.msra.mxu0 %v2821_v8 }
 0xb21   :  { %2453 = vmatprep.subr.mxu0 %v2733_v5 }
 0xb22   :  { %2454 = vmatpush3.msra.mxu0 %v2833_v10 }
 0xb23   :  { %2455 = vmatprep.subr.mxu0 %v2733_v5 }
 0xb24   :  { %2456 = vmatpush3.msra.mxu0 %v2842_v11  ;;  %v1050_v35 = vld [vmem:[#allocation3 + $0x18] sm:$0xff] }
 0xb25   :  { %2471 = vmatprep.subr.mxu0 %v1058_v23 }
 0xbdd   :  { %v693_v50 = vpop.f32.mrf.mxu0 }
 0xbde   :  { %v697_v51 = vadd.f32 %v693_v50, %v169_v49 }
 0xbdf   :  { %v2437_v52 = vpop.f32.mrf.mxu0 }
 0xbe0   :  { %v2216_v53 = vmul.f32 -1.442695, %v697_v51 }
 0xbe2   :  { %2637 = vpow2.f32 %v2216_v53  ;;  %v3033_v53 = vld [vmem:[%s3309_s5 + $0x18] sm:$0xff] }
 0xbe3   :  { %2639 = vtanh.f32 %v697_v51 }
 0xbef   :  { %v2638_v54 = vpop.eup %2637 }
 0xbf0   :  { %v702_v55 = vadd.f32 1.0, %v2638_v54  ;;  %v2640_v56 = vpop.eup %2639  ;;  %v3039_v54 = vld [vmem:[%s3309_s5 + $0x10] sm:$0xff] }
 0xbf2   :  { %2641 = vrcp.f32 %v702_v55  ;;  %v3046_v55 = vld [vmem:[%s3309_s5 + $0x8] sm:$0xff] }
 0xbff   :  { %v2642_v57 = vpop.eup %2641 }
 0xc00   :  { %v705_v58 = vsel %vm2883_vm5, %v2640_v56, %v2642_v57  ;;  %v3053_v56 = vld [vmem:[%s3309_s5] sm:$0xff] }
 0xc01   :  { %708 = vrot.lane.b32.xlu0 %v705_v58, %s2735_s3  ;;  %v706_v13 = vmul.f32 %v705_v58, %v610_v44 }
 0xc73   :  { %v709_v59 = vpop.permute.xlu0 %708 }
 0xc74   :  { %v711_v60 = vmul.f32 %v709_v59, %v705_v58 }
 0xc76   :  { %713 = vrot.lane.b32.xlu1 %v711_v60, %s2736_s10 }
 0xce8   :  { %v714_v61 = vpop.permute.xlu1 %713 }
 0xce9   :  { %v716_v62 = vadd.f32 %v714_v61, %v706_v13  ;;  %v184_v13 = vadd.f32 %v2873_v15, %v2878_v17 }
 0xceb   :  { %2643 = vtanh.f32 %v716_v62 }
 0xcf8   :  { %v2644_v63 = vpop.eup %2643 }
 0xcf9   :  { %719 = vrot.lane.b32.xlu0 %v2644_v63, %s2735_s3 }
 0xd6b   :  { %v720_v0 = vpop.permute.xlu0 %719 }
 0xd6c   :  { %v722_v1 = vmul.f32 %v720_v0, %v705_v58 }
 0xd6e   :  { %724 = vrot.lane.b32.xlu1 %v722_v1, %s2736_s10 }
 0xde0   :  { %v725_v2 = vpop.permute.xlu1 %724 }
 0xde1   :  { %728 = vst.msk [vmem:[#allocation3 + $0x20] sm:$0xff] %vm200_vm6, %v725_v2  ;;  %2447 = vmatmul.mubr.msk.f32.vlgmr.msra.gmra.mxu1 %vm200_vm6, %v725_v2  ;;  %v3090_v2 = vld [vmem:[%s3310_s6] ss:$0 sm:$0xff] }
 0xde2   :  { %2461 = vmatpush3.msra.mxu1 %v2801_v3  ;;  %2468 = vmatprep.mubr.msk.f32.mxu1 %vm2734_vm2, %v2733_v5  ;;  %v174_v3 = vadd.f32 %v2869_v12, %v2878_v17 }
 0xde3   :  { %2462 = vmatprep.subr.mxu1 %v2733_v5 }
 0xde4   :  { %2463 = vmatpush3.msra.mxu1 %v2821_v8 }
 0xde5   :  { %2464 = vmatprep.subr.mxu1 %v2733_v5 }
 0xde6   :  { %2465 = vmatpush3.msra.mxu1 %v2833_v10 }
 0xde7   :  { %2466 = vmatprep.subr.mxu1 %v2733_v5 }
 0xde8   :  { %2467 = vmatpush3.msra.mxu1 %v2842_v11  ;;  %v1051_v36 = vld [vmem:[#allocation3 + $0x20] sm:$0xff] }
 0xde9   :  { %2491 = vmatprep.subr.mxu1 %v2733_v5 }
 0xea1   :  { %v799_v4 = vpop.f32.mrf.mxu1 }
 0xea2   :  { %v803_v6 = vadd.f32 %v799_v4, %v174_v3 }
 0xea3   :  { %v2448_v7 = vpop.f32.mrf.mxu1 }
 0xea4   :  { %v2218_v9 = vmul.f32 -1.442695, %v803_v6 }
 0xea6   :  { %2645 = vpow2.f32 %v2218_v9 }
 0xea7   :  { %2647 = vtanh.f32 %v803_v6 }
 0xeb3   :  { %v2646_v14 = vpop.eup %2645 }
 0xeb4   :  { %v808_v8 = vadd.f32 1.0, %v2646_v14  ;;  %v2648_v16 = vpop.eup %2647 }
 0xeb6   :  { %2649 = vrcp.f32 %v808_v8 }
 0xec3   :  { %v2650_v10 = vpop.eup %2649 }
 0xec4   :  { %v811_v19 = vsel %vm2883_vm5, %v2648_v16, %v2650_v10 }
 0xec5   :  { %814 = vrot.lane.b32.xlu0 %v811_v19, %s2735_s3  ;;  %v812_v12 = vmul.f32 %v811_v19, %v716_v62 }
 0xf37   :  { %v815_v11 = vpop.permute.xlu0 %814 }
 0xf38   :  { %v817_v20 = vmul.f32 %v815_v11, %v811_v19 }
 0xf3a   :  { %819 = vrot.lane.b32.xlu1 %v817_v20, %s2736_s10 }
 0xfac   :  { %v820_v21 = vpop.permute.xlu1 %819 }
 0xfad   :  { %v822_v22 = vadd.f32 %v820_v21, %v812_v12 }
 0xfaf   :  { %2651 = vtanh.f32 %v822_v22 }
 0xfbc   :  { %v2652_v24 = vpop.eup %2651 }
 0xfbd   :  { %825 = vrot.lane.b32.xlu0 %v2652_v24, %s2735_s3 }
0x102f   :  { %v826_v25 = vpop.permute.xlu0 %825 }
0x1030   :  { %v828_v26 = vmul.f32 %v826_v25, %v811_v19 }
0x1032   :  { %830 = vrot.lane.b32.xlu1 %v828_v26, %s2736_s10 }
0x10a4   :  { %v831_v27 = vpop.permute.xlu1 %830 }
0x10a5   :  { %834 = vst.msk [vmem:[#allocation3 + $0x28] sm:$0xff] %vm200_vm6, %v831_v27  ;;  %2458 = vmatmul.mubr.msk.f32.vlgmr.msra.gmra.mxu0 %vm200_vm6, %v831_v27 }
0x10a6   :  { %2472 = vmatpush3.msra.mxu0 %v1058_v23  ;;  %2479 = vmatprep.mubr.msk.f32.mxu0 %vm200_vm6, %v1047_v30 }
0x10a7   :  { %2473 = vmatprep.subr.mxu0 %v1057_v29 }
0x10a8   :  { %2474 = vmatpush3.msra.mxu0 %v1057_v29 }
0x10a9   :  { %2475 = vmatprep.subr.mxu0 %v1056_v31 }
0x10aa   :  { %2476 = vmatpush3.msra.mxu0 %v1056_v31 }
0x10ab   :  { %2477 = vmatprep.subr.mxu0 %v1055_v32 }
0x10ac   :  { %2478 = vmatpush3.msra.mxu0 %v1055_v32  ;;  %v1052_v37 = vld [vmem:[#allocation3 + $0x28] sm:$0xff] }
0x10ad   :  { %2480 = vmatmul.mubr.msk.f32.vlgmr.msra.gmra.mxu0 %vm200_vm6, %v1048_v33  ;;  %2513 = vmatprep.subr.mxu0 %v2733_v5 }
0x10ae   :  { %2482 = vmatprep.mubr.msk.f32.mxu0 %vm200_vm6, %v1049_v34  ;;  %2514 = vmatpush3.msra.mxu0 %v3033_v53 }
0x10af   :  { %2515 = vmatprep.subr.mxu0 %v2733_v5 }
0x10b0   :  { %2516 = vmatpush3.msra.mxu0 %v3039_v54 }
0x10b1   :  { %2483 = vmatmul.mubr.msk.f32.gmra.mxu0 %vm200_vm6, %v1050_v35  ;;  %2517 = vmatprep.subr.mxu0 %v2733_v5 }
0x10b2   :  { %2485 = vmatprep.mubr.msk.f32.mxu0 %vm200_vm6, %v1051_v36  ;;  %2518 = vmatpush3.msra.mxu0 %v3046_v55 }
0x10b3   :  { %2519 = vmatprep.subr.mxu0 %v2733_v5 }
0x10b4   :  { %2520 = vmatpush3.msra.mxu0 %v3053_v56 }
0x10b5   :  { %2486 = vmatmul.mubr.msk.f32.gmra.mxu0 %vm200_vm6, %v1052_v37  ;;  %2535 = vmatprep.subr.mxu0 %v2733_v5 }
0x1165   :  { %v905_v39 = vpop.f32.mrf.mxu0 }
0x1166   :  { %v909_v40 = vadd.f32 %v905_v39, %v179_v38 }
0x1167   :  { %v2459_v41 = vpop.f32.mrf.mxu0 }
0x1168   :  { %v2220_v42 = vmul.f32 -1.442695, %v909_v40 }
0x116a   :  { %2653 = vpow2.f32 %v2220_v42 }
0x116b   :  { %2655 = vtanh.f32 %v909_v40 }
0x116d   :  { %v3085_v61 = vpop.f32.mrf.mxu0 }
0x116e   :  { %v1162_v40 = vadd.f32 %v3085_v61, %v3090_v2 }
0x116f   :  { %v1156_v1 = vpop.f32.mrf.mxu0 }
0x1170   :  { %v1157_v3 = vadd.f32 %v3090_v2, %v1156_v1 }
0x1177   :  { %v2654_v43 = vpop.eup %2653 }
0x1178   :  { %v914_v44 = vadd.f32 1.0, %v2654_v43  ;;  %v2656_v45 = vpop.eup %2655 }
0x117a   :  { %2657 = vrcp.f32 %v914_v44 }
0x1187   :  { %v2658_v46 = vpop.eup %2657 }
0x1188   :  { %v917_v47 = vsel %vm2883_vm5, %v2656_v45, %v2658_v46 }
0x1189   :  { %920 = vrot.lane.b32.xlu0 %v917_v47, %s2735_s3  ;;  %v918_v18 = vmul.f32 %v917_v47, %v822_v22 }
0x11fb   :  { %v921_v48 = vpop.permute.xlu0 %920 }
0x11fc   :  { %v923_v49 = vmul.f32 %v921_v48, %v917_v47 }
0x11fe   :  { %925 = vrot.lane.b32.xlu1 %v923_v49, %s2736_s10 }
0x1270   :  { %v926_v50 = vpop.permute.xlu1 %925 }
0x1271   :  { %v3026_v51 = vadd.f32 %v926_v50, %v918_v18 }
0x1273   :  { %2659 = vtanh.f32 %v3026_v51 }
0x1280   :  { %v2660_v52 = vpop.eup %2659 }
0x1281   :  { %931 = vrot.lane.b32.xlu0 %v2660_v52, %s2735_s3 }
0x12f3   :  { %v932_v57 = vpop.permute.xlu0 %931 }
0x12f4   :  { %v934_v58 = vmul.f32 %v932_v57, %v917_v47 }
0x12f6   :  { %936 = vrot.lane.b32.xlu1 %v934_v58, %s2736_s10 }
0x1368   :  { %v937_v59 = vpop.permute.xlu1 %936 }
0x1369   :  { %940 = vst.msk [vmem:[#allocation3 + $0x30] sm:$0xff] %vm200_vm6, %v937_v59  ;;  %2469 = vmatmul.mubr.msk.f32.vlgmr.msra.gmra.mxu1 %vm200_vm6, %v937_v59 }
0x136a   :  { %2492 = vmatpush3.msra.mxu1 %v3033_v53  ;;  %2499 = vmatprep.mubr.msk.f32.mxu1 %vm2734_vm2, %v2733_v5 }
0x136b   :  { %2493 = vmatprep.subr.mxu1 %v2733_v5 }
0x136c   :  { %2494 = vmatpush3.msra.mxu1 %v3039_v54 }
0x136d   :  { %2495 = vmatprep.subr.mxu1 %v2733_v5 }
0x136e   :  { %2496 = vmatpush3.msra.mxu1 %v3046_v55 }
0x136f   :  { %2497 = vmatprep.subr.mxu1 %v2733_v5 }
0x1370   :  { %2498 = vmatpush3.msra.mxu1 %v3053_v56  ;;  %v1053_v60 = vld [vmem:[#allocation3 + $0x30] sm:$0xff] }
0x1371   :  { %2500 = vmatmul.mubr.f32.vlgmr.msra.gmra.mxu1 %v2733_v5  ;;  %2488 = vmatprep.mubr.msk.f32.mxu0 %vm200_vm6, %v1053_v60 }
0x1372   :  { %2502 = vmatprep.subr.mxu1 %v2733_v5  ;;  %2510 = vmatprep.mubr.msk.f32.mxu1 %vm2734_vm2, %v2733_v5 }
0x1373   :  { %2503 = vmatpush3.msra.mxu1 %v3033_v53 }
0x1374   :  { %2504 = vmatprep.subr.mxu1 %v2733_v5 }
0x1375   :  { %2505 = vmatpush3.msra.mxu1 %v3039_v54 }
0x1376   :  { %2506 = vmatprep.subr.mxu1 %v2733_v5 }
0x1377   :  { %2507 = vmatpush3.msra.mxu1 %v3046_v55 }
0x1378   :  { %2508 = vmatprep.subr.mxu1 %v2733_v5 }
0x1379   :  { %2509 = vmatpush3.msra.mxu1 %v3053_v56 }
0x137a   :  { %2524 = vmatprep.subr.mxu1 %v2733_v5 }
0x1429   :  { %v1011_v62 = vpop.f32.mrf.mxu1 }
0x142a   :  { %v1015_v63 = vadd.f32 %v1011_v62, %v184_v13 }
0x142b   :  { %v2470_v0 = vpop.f32.mrf.mxu1 }
0x142c   :  { %v2222_v11 = vmul.f32 -1.442695, %v1015_v63 }
0x1431   :  { %v1274_v4 = vpop.f32.mrf.mxu1 }
0x1432   :  { %v1278_v6 = vadd.f32 %v1274_v4, %v1157_v3 }
0x1433   :  { %v2501_v7 = vpop.f32.mrf.mxu1 }
0x1434   :  { %v2232_v9 = vmul.f32 -1.442695, %v1278_v6 }
0x1436   :  { %2661 = vpow2.f32 %v2232_v9 }
0x1437   :  { %2663 = vtanh.f32 %v1278_v6 }
0x1443   :  { %v2662_v14 = vpop.eup %2661 }
0x1444   :  { %v1283_v15 = vadd.f32 1.0, %v2662_v14  ;;  %v2664_v17 = vpop.eup %2663 }
0x1446   :  { %2665 = vrcp.f32 %v1283_v15 }
0x1447   :  { %2667 = vpow2.f32 %v2222_v11 }
0x1453   :  { %v2666_v8 = vpop.eup %2665 }
0x1454   :  { %v1286_v16 = vsel %vm2883_vm5, %v2664_v17, %v2666_v8  ;;  %v2668_v20 = vpop.eup %2667 }
0x1455   :  { %1289 = vrot.lane.b32.xlu0 %v1286_v16, %s2735_s3  ;;  %v1287_v12 = vmul.f32 0.0, %v1286_v16  ;;  %v1020_v21 = vadd.f32 1.0, %v2668_v20 }
0x14c7   :  { %v1290_v10 = vpop.permute.xlu0 %1289 }
0x14c8   :  { %v1292_v19 = vmul.f32 %v1290_v10, %v1286_v16 }
0x14ca   :  { %1294 = vrot.lane.b32.xlu1 %v1292_v19, %s2736_s10 }
0x153c   :  { %v1295_v22 = vpop.permute.xlu1 %1294 }
0x153d   :  { %v1297_v23 = vadd.f32 %v1295_v22, %v1287_v12 }
0x153f   :  { %2669 = vtanh.f32 %v1297_v23 }
0x1540   :  { %2671 = vrcp.f32 %v1020_v21 }
0x1541   :  { %2673 = vtanh.f32 %v1015_v63  ;;  %v2484_v63 = vpop.f32.mrf.mxu0 }
0x1543   :  { %v1166_v0 = vpop.f32.mrf.mxu0 }
0x1544   :  { %v1167_v7 = vadd.f32 %v3090_v2, %v1166_v0 }
0x1545   :  { %v3142_v1 = vpop.f32.mrf.mxu0 }
0x1547   :  { %v3144_v3 = vpop.f32.mrf.mxu0 }
0x154c   :  { %v2670_v24 = vpop.eup %2669 }
0x154d   :  { %v2672_v25 = vpop.eup %2671  ;;  %1300 = vrot.lane.b32.xlu0 %v2670_v24, %s2735_s3 }
0x154e   :  { %v2674_v26 = vpop.eup %2673 }
0x154f   :  { %v1023_v27 = vsel %vm2883_vm5, %v2674_v26, %v2672_v25 }
0x1550   :  { %v1024_v34 = vmul.f32 %v1023_v27, %v3026_v51 }
0x1551   :  { %1026 = vrot.lane.b32.xlu0 %v1023_v27, %s2735_s3 }
0x15bf   :  { %v1301_v29 = vpop.permute.xlu0 %1300 }
0x15c0   :  { %v1303_v30 = vmul.f32 %v1301_v29, %v1286_v16  ;;  %v1172_v29 = vadd.f32 %v2484_v63, %v3090_v2 }
0x15c2   :  { %1305 = vrot.lane.b32.xlu1 %v1303_v30, %s2736_s10 }
0x15c3   :  { %v1027_v31 = vpop.permute.xlu0 %1026 }
0x15c4   :  { %v1029_v32 = vmul.f32 %v1027_v31, %v1023_v27 }
0x15c6   :  { %1031 = vrot.lane.b32.xlu0 %v1029_v32, %s2736_s10 }
0x1634   :  { %v1306_v33 = vpop.permute.xlu1 %1305 }
0x1635   :  { %1308 = vst.msk [vmem:[#allocation3] sm:$0xff] %vm200_vm6, %v1306_v33  ;;  %2511 = vmatmul.mubr.msk.f32.vlgmr.msra.gmra.mxu1 %vm200_vm6, %v1306_v33 }
0x1636   :  { %2525 = vmatpush3.msra.mxu1 %v3033_v53  ;;  %2532 = vmatprep.mubr.msk.f32.mxu1 %vm2734_vm2, %v2733_v5 }
0x1637   :  { %2526 = vmatprep.subr.mxu1 %v2733_v5 }
0x1638   :  { %v1032_v35 = vpop.permute.xlu0 %1031  ;;  %2527 = vmatpush3.msra.mxu1 %v3039_v54 }
0x1639   :  { %v1034_v36 = vadd.f32 %v1032_v35, %v1024_v34  ;;  %2528 = vmatprep.subr.mxu1 %v2733_v5 }
0x163a   :  { %2529 = vmatpush3.msra.mxu1 %v3046_v55 }
0x163b   :  { %2675 = vtanh.f32 %v1034_v36  ;;  %2530 = vmatprep.subr.mxu1 %v2733_v5 }
0x163c   :  { %2531 = vmatpush3.msra.mxu1 %v3053_v56 }
0x163d   :  { %2546 = vmatprep.subr.mxu1 %v2733_v5 }
0x1648   :  { %v2676_v37 = vpop.eup %2675 }
0x1649   :  { %1037 = vrot.lane.b32.xlu0 %v2676_v37, %s2735_s3 }
0x16bb   :  { %v1038_v38 = vpop.permute.xlu0 %1037 }
0x16bc   :  { %v1040_v39 = vmul.f32 %v1038_v38, %v1023_v27 }
0x16be   :  { %1042 = vrot.lane.b32.xlu0 %v1040_v39, %s2736_s10 }
0x16f5   :  { %v1378_v41 = vpop.f32.mrf.mxu1 }
0x16f6   :  { %v1382_v42 = vadd.f32 %v1378_v41, %v1162_v40 }
0x16f7   :  { %v2512_v43 = vpop.f32.mrf.mxu1 }
0x16f8   :  { %v2234_v44 = vmul.f32 -1.442695, %v1382_v42 }
0x16fa   :  { %2677 = vpow2.f32 %v2234_v44 }
0x16fb   :  { %2679 = vtanh.f32 %v1382_v42 }
0x1707   :  { %v2678_v45 = vpop.eup %2677 }
0x1708   :  { %v1387_v46 = vadd.f32 1.0, %v2678_v45  ;;  %v2680_v47 = vpop.eup %2679 }
0x170a   :  { %2681 = vrcp.f32 %v1387_v46 }
0x1717   :  { %v2682_v48 = vpop.eup %2681 }
0x1718   :  { %v1390_v49 = vsel %vm2883_vm5, %v2680_v47, %v2682_v48  ;;  %v1177_v48 = vadd.f32 %v3090_v2, %v3144_v3 }
0x1719   :  { %1393 = vrot.lane.b32.xlu1 %v1390_v49, %s2735_s3  ;;  %v1391_v57 = vmul.f32 %v1390_v49, %v1297_v23 }
0x1730   :  { %v1043_v18 = vpop.permute.xlu0 %1042 }
0x1731   :  { %1046 = vst.msk [vmem:[#allocation3 + $0x38] sm:$0xff] %vm200_vm6, %v1043_v18 }
0x1738   :  { %v1054_v50 = vld [vmem:[#allocation3 + $0x38] sm:$0xff] }
0x1739   :  { %2489 = vmatmul.mubr.msk.f32.gmra.mxu0 %vm200_vm6, %v1054_v50 }
0x173a   :  { %2521 = vmatprep.mubr.msk.f32.mxu0 %vm2734_vm2, %v2733_v5 }
0x178b   :  { %v1394_v51 = vpop.permute.xlu1 %1393 }
0x178c   :  { %v1396_v52 = vmul.f32 %v1394_v51, %v1390_v49 }
0x178e   :  { %1398 = vrot.lane.b32.xlu1 %v1396_v52, %s2736_s10 }
0x17f9   :  { %v3146_v4 = vpop.f32.mrf.mxu0 }
0x17fb   :  { %v3148_v6 = vpop.f32.mrf.mxu0 }
0x1800   :  { %v1399_v58 = vpop.permute.xlu1 %1398 }
0x1801   :  { %v1401_v59 = vadd.f32 %v1399_v58, %v1391_v57 }
0x1803   :  { %2683 = vtanh.f32 %v1401_v59 }
0x1810   :  { %v2684_v60 = vpop.eup %2683 }
0x1811   :  { %1404 = vrot.lane.b32.xlu1 %v2684_v60, %s2735_s3 }
0x1883   :  { %v1405_v13 = vpop.permute.xlu1 %1404 }
0x1884   :  { %v1407_v61 = vmul.f32 %v1405_v13, %v1390_v49 }
0x1886   :  { %1409 = vrot.lane.b32.xlu1 %v1407_v61, %s2736_s10 }
0x18f8   :  { %v1410_v62 = vpop.permute.xlu1 %1409 }
0x18f9   :  { %1412 = vst.msk [vmem:[#allocation3 + $0x8] sm:$0xff] %vm200_vm6, %v1410_v62  ;;  %2522 = vmatmul.mubr.msk.f32.vlgmr.msra.gmra.mxu0 %vm200_vm6, %v1410_v62 }
0x18fa   :  { %2536 = vmatpush3.msra.mxu0 %v3033_v53  ;;  %2543 = vmatprep.mubr.msk.f32.mxu0 %vm2734_vm2, %v2733_v5 }
0x18fb   :  { %2537 = vmatprep.subr.mxu0 %v2733_v5 }
0x18fc   :  { %2538 = vmatpush3.msra.mxu0 %v3039_v54 }
0x18fd   :  { %2539 = vmatprep.subr.mxu0 %v2733_v5 }
0x18fe   :  { %2540 = vmatpush3.msra.mxu0 %v3046_v55 }
0x18ff   :  { %2541 = vmatprep.subr.mxu0 %v2733_v5 }
0x1900   :  { %2542 = vmatpush3.msra.mxu0 %v3053_v56 }
0x1901   :  { %2557 = vmatprep.subr.mxu0 %v2733_v5 }
0x19b9   :  { %v1482_v9 = vpop.f32.mrf.mxu0 }
0x19ba   :  { %v1486_v14 = vadd.f32 %v1482_v9, %v1167_v7 }
0x19bb   :  { %v2523_v15 = vpop.f32.mrf.mxu0 }
0x19bc   :  { %v2236_v17 = vmul.f32 -1.442695, %v1486_v14  ;;  %v1182_v15 = vadd.f32 %v3142_v1, %v3090_v2 }
0x19be   :  { %2685 = vpow2.f32 %v2236_v17 }
0x19bf   :  { %2687 = vtanh.f32 %v1486_v14 }
0x19cb   :  { %v2686_v8 = vpop.eup %2685 }
0x19cc   :  { %v1491_v16 = vadd.f32 1.0, %v2686_v8  ;;  %v2688_v10 = vpop.eup %2687 }
0x19ce   :  { %2689 = vrcp.f32 %v1491_v16 }
0x19db   :  { %v2690_v19 = vpop.eup %2689 }
0x19dc   :  { %v1494_v11 = vsel %vm2883_vm5, %v2688_v10, %v2690_v19 }
0x19dd   :  { %1497 = vrot.lane.b32.xlu0 %v1494_v11, %s2735_s3  ;;  %v1495_v21 = vmul.f32 %v1494_v11, %v1401_v59 }
0x1a4f   :  { %v1498_v20 = vpop.permute.xlu0 %1497 }
0x1a50   :  { %v1500_v12 = vmul.f32 %v1498_v20, %v1494_v11 }
0x1a52   :  { %1502 = vrot.lane.b32.xlu1 %v1500_v12, %s2736_s10 }
0x1ac4   :  { %v1503_v22 = vpop.permute.xlu1 %1502 }
0x1ac5   :  { %v1505_v23 = vadd.f32 %v1503_v22, %v1495_v21  ;;  %v2048_v21 = vld [vmem:[%s3311_s7 + $0x18] sm:$0xff] }
0x1ac7   :  { %2691 = vtanh.f32 %v1505_v23 }
0x1ad4   :  { %v2692_v24 = vpop.eup %2691 }
0x1ad5   :  { %1508 = vrot.lane.b32.xlu0 %v2692_v24, %s2735_s3 }
0x1b47   :  { %v1509_v25 = vpop.permute.xlu0 %1508 }
0x1b48   :  { %v1511_v26 = vmul.f32 %v1509_v25, %v1494_v11 }
0x1b4a   :  { %1513 = vrot.lane.b32.xlu1 %v1511_v26, %s2736_s10  ;;  %v2047_v26 = vld [vmem:[%s3311_s7 + $0x10] sm:$0xff] }
0x1bbc   :  { %v1514_v27 = vpop.permute.xlu1 %1513 }
0x1bbd   :  { %1516 = vst.msk [vmem:[#allocation3 + $0x10] sm:$0xff] %vm200_vm6, %v1514_v27  ;;  %2533 = vmatmul.mubr.msk.f32.vlgmr.msra.gmra.mxu1 %vm200_vm6, %v1514_v27  ;;  %v2037_v27 = vld [vmem:[#allocation3] sm:$0xff] }
0x1bbe   :  { %2547 = vmatpush3.msra.mxu1 %v3033_v53  ;;  %2554 = vmatprep.mubr.msk.f32.mxu1 %vm2734_vm2, %v2733_v5 }
0x1bbf   :  { %2548 = vmatprep.subr.mxu1 %v2733_v5 }
0x1bc0   :  { %2549 = vmatpush3.msra.mxu1 %v3039_v54 }
0x1bc1   :  { %2550 = vmatprep.subr.mxu1 %v2733_v5 }
0x1bc2   :  { %2551 = vmatpush3.msra.mxu1 %v3046_v55 }
0x1bc3   :  { %2552 = vmatprep.subr.mxu1 %v2733_v5 }
0x1bc4   :  { %2553 = vmatpush3.msra.mxu1 %v3053_v56 }
0x1bc5   :  { %2568 = vmatprep.subr.mxu1 %v2733_v5 }
0x1c7d   :  { %v1586_v30 = vpop.f32.mrf.mxu1 }
0x1c7e   :  { %v1590_v31 = vadd.f32 %v1586_v30, %v1172_v29  ;;  %v2046_v29 = vld [vmem:[%s3311_s7 + $0x8] sm:$0xff]  ;;  %v2045_v30 = vld [vmem:[%s3311_s7] sm:$0xff] }
0x1c7f   :  { %v2534_v32 = vpop.f32.mrf.mxu1 }
0x1c80   :  { %v2238_v33 = vmul.f32 -1.442695, %v1590_v31  ;;  %v2039_v32 = vld [vmem:[#allocation3 + $0x10] sm:$0xff] }
0x1c82   :  { %2693 = vpow2.f32 %v2238_v33 }
0x1c83   :  { %2695 = vtanh.f32 %v1590_v31  ;;  %v2038_v31 = vld [vmem:[#allocation3 + $0x8] sm:$0xff] }
0x1c8f   :  { %v2694_v34 = vpop.eup %2693 }
0x1c90   :  { %v1595_v35 = vadd.f32 1.0, %v2694_v34  ;;  %v2696_v36 = vpop.eup %2695 }
0x1c92   :  { %2697 = vrcp.f32 %v1595_v35 }
0x1c9f   :  { %v2698_v37 = vpop.eup %2697 }
0x1ca0   :  { %v1598_v38 = vsel %vm2883_vm5, %v2696_v36, %v2698_v37  ;;  %v1187_v36 = vadd.f32 %v3090_v2, %v3148_v6 }
0x1ca1   :  { %1601 = vrot.lane.b32.xlu0 %v1598_v38, %s2735_s3  ;;  %v1599_v41 = vmul.f32 %v1598_v38, %v1505_v23 }
0x1d13   :  { %v1602_v39 = vpop.permute.xlu0 %1601 }
0x1d14   :  { %v1604_v40 = vmul.f32 %v1602_v39, %v1598_v38 }
0x1d16   :  { %1606 = vrot.lane.b32.xlu1 %v1604_v40, %s2736_s10 }
0x1d88   :  { %v1607_v42 = vpop.permute.xlu1 %1606 }
0x1d89   :  { %v1609_v43 = vadd.f32 %v1607_v42, %v1599_v41  ;;  %v3242_v41 = vld [vmem:[%s3312_s8] ss:$0 sm:$0xff] }
0x1d8b   :  { %2699 = vtanh.f32 %v1609_v43 }
0x1d98   :  { %v2700_v44 = vpop.eup %2699 }
0x1d99   :  { %1612 = vrot.lane.b32.xlu0 %v2700_v44, %s2735_s3 }
0x1e0b   :  { %v1613_v45 = vpop.permute.xlu0 %1612 }
0x1e0c   :  { %v1615_v46 = vmul.f32 %v1613_v45, %v1598_v38 }
0x1e0e   :  { %1617 = vrot.lane.b32.xlu1 %v1615_v46, %s2736_s10 }
0x1e80   :  { %v1618_v47 = vpop.permute.xlu1 %1617 }
0x1e81   :  { %1620 = vst.msk [vmem:[#allocation3 + $0x18] sm:$0xff] %vm200_vm6, %v1618_v47  ;;  %2544 = vmatmul.mubr.msk.f32.vlgmr.msra.gmra.mxu0 %vm200_vm6, %v1618_v47 }
0x1e82   :  { %2558 = vmatpush3.msra.mxu0 %v3033_v53  ;;  %2565 = vmatprep.mubr.msk.f32.mxu0 %vm2734_vm2, %v2733_v5 }
0x1e83   :  { %2559 = vmatprep.subr.mxu0 %v2733_v5 }
0x1e84   :  { %2560 = vmatpush3.msra.mxu0 %v3039_v54 }
0x1e85   :  { %2561 = vmatprep.subr.mxu0 %v2733_v5 }
0x1e86   :  { %2562 = vmatpush3.msra.mxu0 %v3046_v55 }
0x1e87   :  { %2563 = vmatprep.subr.mxu0 %v2733_v5 }
0x1e88   :  { %2564 = vmatpush3.msra.mxu0 %v3053_v56  ;;  %v2040_v33 = vld [vmem:[#allocation3 + $0x18] sm:$0xff] }
0x1e89   :  { %2579 = vmatprep.subr.mxu0 %v2048_v21 }
0x1f41   :  { %v1690_v49 = vpop.f32.mrf.mxu0 }
0x1f42   :  { %v1694_v18 = vadd.f32 %v1690_v49, %v1177_v48 }
0x1f43   :  { %v2545_v50 = vpop.f32.mrf.mxu0 }
0x1f44   :  { %v2240_v51 = vmul.f32 -1.442695, %v1694_v18 }
0x1f46   :  { %2701 = vpow2.f32 %v2240_v51 }
0x1f47   :  { %2703 = vtanh.f32 %v1694_v18 }
0x1f53   :  { %v2702_v52 = vpop.eup %2701 }
0x1f54   :  { %v1699_v57 = vadd.f32 1.0, %v2702_v52  ;;  %v2704_v58 = vpop.eup %2703 }
0x1f56   :  { %2705 = vrcp.f32 %v1699_v57 }
0x1f63   :  { %v2706_v59 = vpop.eup %2705 }
0x1f64   :  { %v1702_v60 = vsel %vm2883_vm5, %v2704_v58, %v2706_v59 }
0x1f65   :  { %1705 = vrot.lane.b32.xlu0 %v1702_v60, %s2735_s3  ;;  %v1703_v62 = vmul.f32 %v1702_v60, %v1609_v43 }
0x1fd7   :  { %v1706_v13 = vpop.permute.xlu0 %1705 }
0x1fd8   :  { %v1708_v61 = vmul.f32 %v1706_v13, %v1702_v60 }
0x1fda   :  { %1710 = vrot.lane.b32.xlu1 %v1708_v61, %s2736_s10 }
0x204c   :  { %v1711_v63 = vpop.permute.xlu1 %1710 }
0x204d   :  { %v1713_v0 = vadd.f32 %v1711_v63, %v1703_v62 }
0x204f   :  { %2707 = vtanh.f32 %v1713_v0 }
0x205c   :  { %v2708_v3 = vpop.eup %2707 }
0x205d   :  { %1716 = vrot.lane.b32.xlu0 %v2708_v3, %s2735_s3 }
0x20cf   :  { %v1717_v7 = vpop.permute.xlu0 %1716 }
0x20d0   :  { %v1719_v9 = vmul.f32 %v1717_v7, %v1702_v60 }
0x20d2   :  { %1721 = vrot.lane.b32.xlu1 %v1719_v9, %s2736_s10 }
0x2144   :  { %v1722_v14 = vpop.permute.xlu1 %1721 }
0x2145   :  { %1724 = vst.msk [vmem:[#allocation3 + $0x20] sm:$0xff] %vm200_vm6, %v1722_v14  ;;  %2555 = vmatmul.mubr.msk.f32.vlgmr.msra.gmra.mxu1 %vm200_vm6, %v1722_v14 }
0x2146   :  { %2569 = vmatpush3.msra.mxu1 %v3033_v53  ;;  %2576 = vmatprep.mubr.msk.f32.mxu1 %vm2734_vm2, %v2733_v5 }
0x2147   :  { %2570 = vmatprep.subr.mxu1 %v2733_v5 }
0x2148   :  { %2571 = vmatpush3.msra.mxu1 %v3039_v54 }
0x2149   :  { %2572 = vmatprep.subr.mxu1 %v2733_v5 }
0x214a   :  { %2573 = vmatpush3.msra.mxu1 %v3046_v55 }
0x214b   :  { %2574 = vmatprep.subr.mxu1 %v2733_v5 }
0x214c   :  { %2575 = vmatpush3.msra.mxu1 %v3053_v56  ;;  %v2041_v34 = vld [vmem:[#allocation3 + $0x20] sm:$0xff] }
0x2205   :  { %v1794_v17 = vpop.f32.mrf.mxu1 }
0x2206   :  { %v1798_v53 = vadd.f32 %v1794_v17, %v1182_v15  ;;  %v1192_v17 = vadd.f32 %v3146_v4, %v3090_v2 }
0x2207   :  { %v2556_v8 = vpop.f32.mrf.mxu1 }
0x2208   :  { %v2242_v16 = vmul.f32 -1.442695, %v1798_v53 }
0x220a   :  { %2709 = vpow2.f32 %v2242_v16 }
0x220b   :  { %2711 = vtanh.f32 %v1798_v53 }
0x2217   :  { %v2710_v10 = vpop.eup %2709 }
0x2218   :  { %v1803_v19 = vadd.f32 1.0, %v2710_v10  ;;  %v2712_v54 = vpop.eup %2711 }
0x221a   :  { %2713 = vrcp.f32 %v1803_v19 }
0x2227   :  { %v2714_v11 = vpop.eup %2713 }
0x2228   :  { %v1806_v55 = vsel %vm2883_vm5, %v2712_v54, %v2714_v11 }
0x2229   :  { %1809 = vrot.lane.b32.xlu0 %v1806_v55, %s2735_s3  ;;  %v1807_v1 = vmul.f32 %v1806_v55, %v1713_v0 }
0x229b   :  { %v1810_v5 = vpop.permute.xlu0 %1809 }
0x229c   :  { %v1812_v56 = vmul.f32 %v1810_v5, %v1806_v55 }
0x229e   :  { %1814 = vrot.lane.b32.xlu1 %v1812_v56, %s2736_s10 }
0x2310   :  { %v1815_v20 = vpop.permute.xlu1 %1814 }
0x2311   :  { %v3212_v12 = vadd.f32 %v1815_v20, %v1807_v1 }
0x2313   :  { %2715 = vtanh.f32 %v3212_v12 }
0x2320   :  { %v2716_v22 = vpop.eup %2715 }
0x2321   :  { %1820 = vrot.lane.b32.xlu0 %v2716_v22, %s2735_s3 }
0x2393   :  { %v1821_v23 = vpop.permute.xlu0 %1820 }
0x2394   :  { %v1823_v24 = vmul.f32 %v1821_v23, %v1806_v55 }
0x2396   :  { %1825 = vrot.lane.b32.xlu1 %v1823_v24, %s2736_s10 }
0x2408   :  { %v1826_v25 = vpop.permute.xlu1 %1825 }
0x2409   :  { %1828 = vst.msk [vmem:[#allocation3 + $0x28] sm:$0xff] %vm200_vm6, %v1826_v25  ;;  %2566 = vmatmul.mubr.msk.f32.vlgmr.msra.gmra.mxu0 %vm200_vm6, %v1826_v25 }
0x240a   :  { %2580 = vmatpush3.msra.mxu0 %v2048_v21  ;;  %2587 = vmatprep.mubr.msk.f32.mxu0 %vm200_vm6, %v2037_v27 }
0x240b   :  { %2581 = vmatprep.subr.mxu0 %v2047_v26 }
0x240c   :  { %2582 = vmatpush3.msra.mxu0 %v2047_v26 }
0x240d   :  { %2583 = vmatprep.subr.mxu0 %v2046_v29 }
0x240e   :  { %2584 = vmatpush3.msra.mxu0 %v2046_v29 }
0x240f   :  { %2585 = vmatprep.subr.mxu0 %v2045_v30 }
0x2410   :  { %2586 = vmatpush3.msra.mxu0 %v2045_v30  ;;  %v2042_v35 = vld [vmem:[#allocation3 + $0x28] sm:$0xff] }
0x2411   :  { %2588 = vmatmul.mubr.msk.f32.vlgmr.msra.gmra.mxu0 %vm200_vm6, %v2038_v31 }
0x2412   :  { %2590 = vmatprep.mubr.msk.f32.mxu0 %vm200_vm6, %v2039_v32 }
0x2415   :  { %2591 = vmatmul.mubr.msk.f32.gmra.mxu0 %vm200_vm6, %v2040_v33 }
0x2416   :  { %2593 = vmatprep.mubr.msk.f32.mxu0 %vm200_vm6, %v2041_v34 }
0x2419   :  { %2594 = vmatmul.mubr.msk.f32.gmra.mxu0 %vm200_vm6, %v2042_v35 }
0x24c9   :  { %v1898_v37 = vpop.f32.mrf.mxu0 }
0x24ca   :  { %v1902_v38 = vadd.f32 %v1898_v37, %v1187_v36 }
0x24cb   :  { %v2567_v39 = vpop.f32.mrf.mxu0 }
0x24cc   :  { %v2244_v40 = vmul.f32 -1.442695, %v1902_v38 }
0x24ce   :  { %2717 = vpow2.f32 %v2244_v40 }
0x24cf   :  { %2719 = vtanh.f32 %v1902_v38 }
0x24d1   :  { %v2589_v42 = vpop.f32.mrf.mxu0 }
0x24d2   :  { %v2152_v43 = vadd.f32 %v2589_v42, %v3242_v41 }
0x24d3   :  { %v2146_v44 = vpop.f32.mrf.mxu0 }
0x24d4   :  { %2187 = vst.msk [vmem:[%s3313_s9 + $0x8] sm:$0xff] %vm2185_vm7, %v2152_v43  ;;  %v2147_v6 = vadd.f32 %v3242_v41, %v2146_v44 }
0x24d5   :  { %v2592_v45 = vpop.f32.mrf.mxu0 }
0x24d6   :  { %2186 = vst.msk [vmem:[%s3313_s9] sm:$0xff] %vm2185_vm7, %v2147_v6  ;;  %v2162_v46 = vadd.f32 %v2592_v45, %v3242_v41 }
0x24d7   :  { %v2156_v47 = vpop.f32.mrf.mxu0 }
0x24d8   :  { %2189 = vst.msk [vmem:[%s3313_s9 + $0x18] sm:$0xff] %vm2185_vm7, %v2162_v46  ;;  %v2157_v48 = vadd.f32 %v3242_v41, %v2156_v47 }
0x24d9   :  { %v2595_v49 = vpop.f32.mrf.mxu0 }
0x24da   :  { %2188 = vst.msk [vmem:[%s3313_s9 + $0x10] sm:$0xff] %vm2185_vm7, %v2157_v48  ;;  %v2172_v18 = vadd.f32 %v2595_v49, %v3242_v41 }
0x24db   :  { %v2718_v50 = vpop.eup %2717  ;;  %v2166_v51 = vpop.f32.mrf.mxu0 }
0x24dc   :  { %v1907_v52 = vadd.f32 1.0, %v2718_v50  ;;  %2191 = vst.msk [vmem:[%s3313_s9 + $0x28] sm:$0xff] %vm2185_vm7, %v2172_v18  ;;  %v2167_v57 = vadd.f32 %v3242_v41, %v2166_v51  ;;  %v2720_v58 = vpop.eup %2719 }
0x24de   :  { %2721 = vrcp.f32 %v1907_v52  ;;  %2190 = vst.msk [vmem:[%s3313_s9 + $0x20] sm:$0xff] %vm2185_vm7, %v2167_v57 }
0x24eb   :  { %v2722_v59 = vpop.eup %2721 }
0x24ec   :  { %v1910_v60 = vsel %vm2883_vm5, %v2720_v58, %v2722_v59 }
0x24ed   :  { %1913 = vrot.lane.b32.xlu0 %v1910_v60, %s2735_s3  ;;  %v1911_v62 = vmul.f32 %v1910_v60, %v3212_v12 }
0x255f   :  { %v1914_v13 = vpop.permute.xlu0 %1913 }
0x2560   :  { %v1916_v61 = vmul.f32 %v1914_v13, %v1910_v60 }
0x2562   :  { %1918 = vrot.lane.b32.xlu1 %v1916_v61, %s2736_s10 }
0x25d4   :  { %v1919_v63 = vpop.permute.xlu1 %1918 }
0x25d5   :  { %v1921_v0 = vadd.f32 %v1919_v63, %v1911_v62 }
0x25d7   :  { %2723 = vtanh.f32 %v1921_v0 }
0x25e4   :  { %v2724_v3 = vpop.eup %2723 }
0x25e5   :  { %1924 = vrot.lane.b32.xlu0 %v2724_v3, %s2735_s3 }
0x2657   :  { %v1925_v7 = vpop.permute.xlu0 %1924 }
0x2658   :  { %v1927_v9 = vmul.f32 %v1925_v7, %v1910_v60 }
0x265a   :  { %1929 = vrot.lane.b32.xlu1 %v1927_v9, %s2736_s10 }
0x26cc   :  { %v1930_v14 = vpop.permute.xlu1 %1929 }
0x26cd   :  { %1932 = vst.msk [vmem:[#allocation3 + $0x30] sm:$0xff] %vm200_vm6, %v1930_v14  ;;  %2577 = vmatmul.mubr.msk.f32.vlgmr.msra.gmra.mxu1 %vm200_vm6, %v1930_v14 }
0x26d4   :  { %v2043_v15 = vld [vmem:[#allocation3 + $0x30] sm:$0xff] }
0x26d5   :  { %2596 = vmatprep.mubr.msk.f32.mxu0 %vm200_vm6, %v2043_v15 }
0x278d   :  { %v2002_v53 = vpop.f32.mrf.mxu1 }
0x278e   :  { %v2006_v8 = vadd.f32 %v2002_v53, %v1192_v17 }
0x278f   :  { %v2578_v16 = vpop.f32.mrf.mxu1 }
0x2790   :  { %v2246_v10 = vmul.f32 -1.442695, %v2006_v8 }
0x2792   :  { %2725 = vpow2.f32 %v2246_v10 }
0x2793   :  { %2727 = vtanh.f32 %v2006_v8 }
0x279f   :  { %v2726_v19 = vpop.eup %2725 }
0x27a0   :  { %v2011_v54 = vadd.f32 1.0, %v2726_v19  ;;  %v2728_v11 = vpop.eup %2727 }
0x27a2   :  { %2729 = vrcp.f32 %v2011_v54 }
0x27af   :  { %v2730_v55 = vpop.eup %2729 }
0x27b0   :  { %v2014_v5 = vsel %vm2883_vm5, %v2728_v11, %v2730_v55 }
0x27b1   :  { %2017 = vrot.lane.b32.xlu0 %v2014_v5, %s2735_s3  ;;  %v2015_v2 = vmul.f32 %v2014_v5, %v1921_v0 }
0x2823   :  { %v2018_v56 = vpop.permute.xlu0 %2017 }
0x2824   :  { %v2020_v1 = vmul.f32 %v2018_v56, %v2014_v5 }
0x2826   :  { %2022 = vrot.lane.b32.xlu1 %v2020_v1, %s2736_s10 }
0x2898   :  { %v2023_v4 = vpop.permute.xlu1 %2022 }
0x2899   :  { %v2025_v20 = vadd.f32 %v2023_v4, %v2015_v2 }
0x289b   :  { %2731 = vtanh.f32 %v2025_v20 }
0x28a8   :  { %v2732_v12 = vpop.eup %2731 }
0x28a9   :  { %2028 = vrot.lane.b32.xlu0 %v2732_v12, %s2735_s3 }
0x291b   :  { %v2029_v21 = vpop.permute.xlu0 %2028 }
0x291c   :  { %v2031_v22 = vmul.f32 %v2029_v21, %v2014_v5 }
0x291e   :  { %2033 = vrot.lane.b32.xlu1 %v2031_v22, %s2736_s10 }
0x2990   :  { %v2034_v23 = vpop.permute.xlu1 %2033 }
0x2991   :  { %2036 = vst.msk [vmem:[#allocation3 + $0x38] sm:$0xff] %vm200_vm6, %v2034_v23 }
0x2998   :  { %v2044_v28 = vld [vmem:[#allocation3 + $0x38] sm:$0xff] }
0x2999   :  { %2597 = vmatmul.mubr.msk.f32.gmra.mxu0 %vm200_vm6, %v2044_v28 }
0x2a59   :  { %v2598_v24 = vpop.f32.mrf.mxu0 }
0x2a5a   :  { %v2182_v25 = vadd.f32 %v2598_v24, %v3242_v41 }
0x2a5b   :  { %v2176_v26 = vpop.f32.mrf.mxu0 }
0x2a5c   :  { %2193 = vst.msk [vmem:[%s3313_s9 + $0x38] sm:$0xff] %vm2185_vm7, %v2182_v25  ;;  %v2177_v27 = vadd.f32 %v3242_v41, %v2176_v26 }
0x2a5e   :  { %2192 = vst.msk [vmem:[%s3313_s9 + $0x30] sm:$0xff] %vm2185_vm7, %v2177_v27 }

</bundles_post_ra>
